<compile_context>
chip_gen: v5e
topology: v5e:2x2
jax: 0.10.0
libtpu: 0.0.40
codegen_flags: <defaults>
</compile_context>

<pallas_src>
import functools

import jax
import jax.numpy as jnp
from jax.experimental import pallas as pl
from jax.experimental.pallas import tpu as pltpu


LN_EPS = 1e-5
AGG_EPS = 1e-10


def _layernorm(h, gamma, beta):
    mu = jnp.mean(h, axis=-1, keepdims=True)
    var = jnp.mean((h - mu) ** 2, axis=-1, keepdims=True)
    return (h - mu) * jax.lax.rsqrt(var + LN_EPS) * gamma + beta


def user_embedding_kernel(
    x_ref,
    w1_ref, b1_ref, g1_ref, be1_ref,
    w2_ref, b2_ref, g2_ref, be2_ref,
    w3_ref, b3_ref, g3_ref, be3_ref,
    out_ref,
    num_acc, den_acc,
    *, tn, n_items,
):
    j = pl.program_id(1)

    # ---- init accumulators at the start of each item sweep -------------------
    @pl.when(j == 0)
    def _():
        num_acc[...] = jnp.zeros_like(num_acc)
        den_acc[...] = jnp.zeros_like(den_acc)

    # ---- masked aggregation over this chunk of items (f32, VPU) --------------
    # x is streamed as bf16 (half the HBM bytes); widen to f32 right after load.
    x = x_ref[...].astype(jnp.float32)                        # [TB, TN, D]
    row_sum = jnp.sum(x, axis=-1, keepdims=True)              # [TB, TN, 1]
    nonzero = row_sum != 0.0                                   # [TB, TN, 1]
    if n_items % tn != 0:
        # Last item block is padded: explicitly mask out-of-range item rows so
        # garbage in the padded region never reaches the accumulators.
        item_idx = j * tn + jax.lax.broadcasted_iota(jnp.int32, (1, tn, 1), 1)
        nonzero = jnp.logical_and(nonzero, item_idx < n_items)
    # select-then-sum: exact original mask semantics, no x*mask temporary.
    num_acc[...] += jnp.sum(jnp.where(nonzero, x, 0.0), axis=1)           # [TB, D]
    # lane-dense (TB,128) accumulator -> unmasked vst in the hot reduction loop.
    den_acc[...] += jnp.sum(nonzero.astype(jnp.float32), axis=1)          # (TB,1) bcast

    # ---- MLP tail on the last item step: (Lin -> LN -> ReLU) x2 -> Lin -> LN -
    @pl.when(j == pl.num_programs(1) - 1)
    def _():
        agg = num_acc[...] / (den_acc[:, 0:1] + AGG_EPS)       # [TB, D] f32

        h = jnp.dot(agg.astype(jnp.bfloat16), w1_ref[...],
                    preferred_element_type=jnp.float32) + b1_ref[...]
        h = jnp.maximum(_layernorm(h, g1_ref[...], be1_ref[...]), 0.0)
        # Dropout: eval mode -> identity.

        h = jnp.dot(h.astype(jnp.bfloat16), w2_ref[...],
                    preferred_element_type=jnp.float32) + b2_ref[...]
        h = jnp.maximum(_layernorm(h, g2_ref[...], be2_ref[...]), 0.0)
        # Dropout: eval mode -> identity.

        h = jnp.dot(h.astype(jnp.bfloat16), w3_ref[...],
                    preferred_element_type=jnp.float32) + b3_ref[...]
        out_ref[...] = _layernorm(h, g3_ref[...], be3_ref[...]).astype(out_ref.dtype)


# --------------------------------------------------------------------------- #
# Tiling / VMEM budget helpers (generation-aware)                              #
# --------------------------------------------------------------------------- #

def _vmem_capacity_bytes():
    try:
        cap = getattr(pltpu.get_tpu_info(), "vmem_capacity_bytes", None)
        if cap:
            return int(cap)
    except Exception:
        pass
    return 64 << 20  # conservative fallback: v7x per-TensorCore VMEM


def _legal_tile(extent, want, unit=8):
    """Largest legal block dim <= want: full extent, or a multiple of 8."""
    if want >= extent:
        return extent
    if extent <= unit:
        return extent
    return max((want // unit) * unit, unit)


def _choose_tiles(b, n, d, x_itemsize, vmem_capacity):
    """Pick (TB, TN): (8,128)-legal tiles sized for the streamed x buffer."""
    two_core_part = vmem_capacity < (100 << 20)                 # v7x-like
    per_buf = (11 << 20) if two_core_part else (36 << 20)       # per stream buffer
    row_bytes = d * x_itemsize

    tb_want = b
    if two_core_part and b >= 16:
        tb_want = b // 2            # guarantee >=2 batch tiles -> both TCs engaged
    tb = _legal_tile(b, min(tb_want, 256))
    while tb > 8 and tb * 8 * row_bytes > per_buf:
        tb = _legal_tile(b, tb // 2)

    max_items = max(per_buf // max(tb * row_bytes, 1), 1)
    tn = _legal_tile(n, max_items)
    return tb, tn


def _vmem_need(tb, tn, d, param_bytes):
    return (2 * tb * tn * d * 2        # streamed x tile (bf16), double-buffered
            + 2 * tb * d * 4           # out tile, double-buffered
            + 2 * param_bytes          # resident params (default 2 buffers each)
            + tb * d * 4               # num_acc scratch
            + tb * 128 * 4)            # den_acc scratch (lane-dense)


# --------------------------------------------------------------------------- #
# Forward wrapper                                                              #
# --------------------------------------------------------------------------- #

@functools.partial(jax.jit, static_argnames=("tile_override",))
def user_embedding_forward(x, params, *, tile_override=None):
    """x: [B, N, D] float (cast to bf16 at the boundary) -> [B, D] float32."""
    b, n, d = x.shape
    # Stream x as bf16: halves HBM bytes on this bandwidth-bound kernel.
    x_stream = x if x.dtype == jnp.bfloat16 else x.astype(jnp.bfloat16)

    args = (
        x_stream,
        params["w1"], params["b1"], params["g1"], params["be1"],
        params["w2"], params["b2"], params["g2"], params["be2"],
        params["w3"], params["b3"], params["g3"], params["be3"],
    )
    param_bytes = sum(int(a.size) * a.dtype.itemsize for a in args[1:])

    vmem_cap = _vmem_capacity_bytes()
    # Generation-aware limit: ~100 MiB on 128-MiB parts, ~56 MiB on 64-MiB parts.
    gen_cap = (100 << 20) if vmem_cap >= (100 << 20) else (56 << 20)

    if tile_override is not None:
        tb = _legal_tile(b, int(tile_override[0]))
        tn = _legal_tile(n, int(tile_override[1]))
    else:
        tb, tn = _choose_tiles(b, n, d, 2, vmem_cap)

    # Recompute need and shrink tiles until it fits (then assert: no silent cap).
    need = _vmem_need(tb, tn, d, param_bytes)
    while need > gen_cap and tn > 8:
        tn = _legal_tile(n, max(tn // 2, 8))
        need = _vmem_need(tb, tn, d, param_bytes)
    while need > gen_cap and tb > 8:
        tb = _legal_tile(b, max(tb // 2, 8))
        need = _vmem_need(tb, tn, d, param_bytes)
    assert need <= gen_cap, (need, gen_cap)
    vmem_limit = min(gen_cap, max(32 << 20, int(1.3 * need) + (2 << 20)))
    assert need <= vmem_limit, (need, vmem_limit)

    grid = (pl.cdiv(b, tb), pl.cdiv(n, tn))

    def _const_spec(a):  # VMEM-resident across all grid steps (constant index map)
        nd = a.ndim
        return pl.BlockSpec(a.shape, lambda i, j, _nd=nd: (0,) * _nd)

    in_specs = [pl.BlockSpec((tb, tn, d), lambda i, j: (i, j, 0))]
    in_specs += [_const_spec(a) for a in args[1:]]
    out_specs = pl.BlockSpec((tb, d), lambda i, j: (i, 0))

    h_dim = params["w1"].shape[1]
    cost = pl.CostEstimate(
        flops=2 * b * n * d + 2 * b * (d * h_dim + h_dim * h_dim + h_dim * d),
        transcendentals=3 * b,  # one rsqrt per row per LayerNorm
        bytes_accessed=int(x_stream.size) * 2 + param_bytes + b * d * 4,
    )

    kernel = functools.partial(user_embedding_kernel, tn=tn, n_items=n)

    return pl.pallas_call(
        kernel,
        out_shape=jax.ShapeDtypeStruct((b, d), jnp.float32),
        grid=grid,
        in_specs=in_specs,
        out_specs=out_specs,
        scratch_shapes=[
            pltpu.VMEM((tb, d), jnp.float32),     # masked-sum numerator
            pltpu.VMEM((tb, 128), jnp.float32),   # mask count (lane-dense)
        ],
        compiler_params=pltpu.CompilerParams(
            dimension_semantics=("parallel", "arbitrary"),
            vmem_limit_bytes=vmem_limit,
        ),
        cost_estimate=cost,
    )(*args)


# --------------------------------------------------------------------------- #
# Params init + pure-JAX reference                                             #
# --------------------------------------------------------------------------- #

def init_params(key, vector_dim, hidden_dim):
    """PyTorch-style (uniform +/- 1/sqrt(fan_in)) Linear init.

    Weights stored bf16 [in, out] (MXU-native); biases / LN params stay f32.
    """
    def linear(k, fan_in, fan_out):
        kw, kb = jax.random.split(k)
        bound = 1.0 / jnp.sqrt(fan_in)
        w = jax.random.uniform(kw, (fan_in, fan_out), jnp.float32, -bound, bound)
        b = jax.random.uniform(kb, (1, fan_out), jnp.float32, -bound, bound)
        return w.astype(jnp.bfloat16), b

    k1, k2, k3 = jax.random.split(key, 3)
    w1, b1 = linear(k1, vector_dim, hidden_dim)
    w2, b2 = linear(k2, hidden_dim, hidden_dim)
    w3, b3 = linear(k3, hidden_dim, vector_dim)
    return {
        "w1": w1, "b1": b1,
        "g1": jnp.ones((1, hidden_dim), jnp.float32),
        "be1": jnp.zeros((1, hidden_dim), jnp.float32),
        "w2": w2, "b2": b2,
        "g2": jnp.ones((1, hidden_dim), jnp.float32),
        "be2": jnp.zeros((1, hidden_dim), jnp.float32),
        "w3": w3, "b3": b3,
        "g3": jnp.ones((1, vector_dim), jnp.float32),
        "be3": jnp.zeros((1, vector_dim), jnp.float32),
    }


def reference_forward(x, params):
    """Pure-JAX reference of the same forward (bf16 x & matmuls, f32 LN/agg)."""
    xf = x.astype(jnp.float32)
    mask = (jnp.sum(xf, axis=-1, keepdims=True) != 0.0).astype(jnp.float32)
    agg = jnp.sum(xf * mask, axis=1) / (jnp.sum(mask, axis=1) + AGG_EPS)

    def ln(h, g, b):
        mu = jnp.mean(h, axis=-1, keepdims=True)
        var = jnp.mean((h - mu) ** 2, axis=-1, keepdims=True)
        return (h - mu) * jax.lax.rsqrt(var + LN_EPS) * g + b

    def lin(h, w, b):
        return jnp.dot(h.astype(jnp.bfloat16), w,
                       preferred_element_type=jnp.float32) + b

    h = jnp.maximum(ln(lin(agg, params["w1"], params["b1"]), params["g1"], params["be1"]), 0.0)
    h = jnp.maximum(ln(lin(h, params["w2"], params["b2"]), params["g2"], params["be2"]), 0.0)
    return ln(lin(h, params["w3"], params["b3"]), params["g3"], params["be3"])


if __name__ == "__main__":
    # Small shapes consistent with the module (defaults 1024/512 scaled down).
    # B and N deliberately not multiples of 8 so the padded-tile paths are
    # exercised by the tile_override run below.
    BATCH, N_ITEMS, VECTOR_DIM, HIDDEN_DIM = 12, 20, 256, 128

    key = jax.random.PRNGKey(0)
    kx, kp = jax.random.split(key)
    x = jax.random.normal(kx, (BATCH, N_ITEMS, VECTOR_DIM), jnp.float32)
    # Zero out some item rows so the mask path is actually exercised.
    x = x.at[0, 3, :].set(0.0)
    x = x.at[5, 0, :].set(0.0)
    x = x.at[5, 19, :].set(0.0)
    x_bf = x.astype(jnp.bfloat16)   # accept bf16 input: halves streamed HBM bytes

    params = init_params(kp, VECTOR_DIM, HIDDEN_DIM)
    ref = reference_forward(x_bf, params)

    # Default (auto-tiled) configuration.
    out = jax.block_until_ready(user_embedding_forward(x_bf, params))
    assert out.shape == (BATCH, VECTOR_DIM)
    assert jnp.allclose(out, ref, atol=2e-3, rtol=2e-3), "mismatch vs JAX reference"

    # Forced multi-tile configuration: grid=(2,3) with padded batch/item blocks,
    # exercising the accumulator sweep and the in-kernel validity masking.
    out_tiled = jax.block_until_ready(
        user_embedding_forward(x_bf, params, tile_override=(8, 8)))
    assert jnp.allclose(out_tiled, ref, atol=2e-3, rtol=2e-3), "tiled mismatch"

    print("KERNEL_OK")
</pallas_src>

<mosaic_0001>
module attributes {stable_mosaic.version = 11 : i64} {
  func.func @user_embedding_kernel(%arg0: i32, %arg1: i32, %arg2: memref<12x20x256xbf16, #tpu.memory_space<vmem>>, %arg3: memref<256x128xbf16, #tpu.memory_space<vmem>>, %arg4: memref<1x128xf32, #tpu.memory_space<vmem>>, %arg5: memref<1x128xf32, #tpu.memory_space<vmem>>, %arg6: memref<1x128xf32, #tpu.memory_space<vmem>>, %arg7: memref<128x128xbf16, #tpu.memory_space<vmem>>, %arg8: memref<1x128xf32, #tpu.memory_space<vmem>>, %arg9: memref<1x128xf32, #tpu.memory_space<vmem>>, %arg10: memref<1x128xf32, #tpu.memory_space<vmem>>, %arg11: memref<128x256xbf16, #tpu.memory_space<vmem>>, %arg12: memref<1x256xf32, #tpu.memory_space<vmem>>, %arg13: memref<1x256xf32, #tpu.memory_space<vmem>>, %arg14: memref<1x256xf32, #tpu.memory_space<vmem>>, %arg15: memref<12x256xf32, #tpu.memory_space<vmem>>, %arg16: memref<12x256xf32, #tpu.memory_space<vmem>>, %arg17: memref<12x128xf32, #tpu.memory_space<vmem>>) attributes {dimension_semantics = [#tpu.dimension_semantics<parallel>, #tpu.dimension_semantics<arbitrary>], iteration_bounds = array<i64: 1, 1>, scalar_prefetch = 0 : i64, scratch_operands = 2 : i64, tpu.core_type = #tpu.core_type<tc>, window_params = [{transform_indices = @transform_0, window_bounds = array<i64: 12, 20, 256>}, {pipeline_mode = #tpu.pipeline_mode<synchronous>, transform_indices = @transform_1, window_bounds = array<i64: 256, 128>}, {pipeline_mode = #tpu.pipeline_mode<synchronous>, transform_indices = @transform_2, window_bounds = array<i64: 1, 128>}, {pipeline_mode = #tpu.pipeline_mode<synchronous>, transform_indices = @transform_3, window_bounds = array<i64: 1, 128>}, {pipeline_mode = #tpu.pipeline_mode<synchronous>, transform_indices = @transform_4, window_bounds = array<i64: 1, 128>}, {pipeline_mode = #tpu.pipeline_mode<synchronous>, transform_indices = @transform_5, window_bounds = array<i64: 128, 128>}, {pipeline_mode = #tpu.pipeline_mode<synchronous>, transform_indices = @transform_6, window_bounds = array<i64: 1, 128>}, {pipeline_mode = #tpu.pipeline_mode<synchronous>, transform_indices = @transform_7, window_bounds = array<i64: 1, 128>}, {pipeline_mode = #tpu.pipeline_mode<synchronous>, transform_indices = @transform_8, window_bounds = array<i64: 1, 128>}, {pipeline_mode = #tpu.pipeline_mode<synchronous>, transform_indices = @transform_9, window_bounds = array<i64: 128, 256>}, {pipeline_mode = #tpu.pipeline_mode<synchronous>, transform_indices = @transform_10, window_bounds = array<i64: 1, 256>}, {pipeline_mode = #tpu.pipeline_mode<synchronous>, transform_indices = @transform_11, window_bounds = array<i64: 1, 256>}, {pipeline_mode = #tpu.pipeline_mode<synchronous>, transform_indices = @transform_12, window_bounds = array<i64: 1, 256>}, {transform_indices = @transform_13, window_bounds = array<i64: 12, 256>}]} {
    %c0_i32 = arith.constant 0 : i32
    %0 = arith.cmpi eq, %arg1, %c0_i32 : i32
    %1 = arith.extui %0 : i1 to i32
    %c0_i32_0 = arith.constant 0 : i32
    %2 = arith.cmpi ne, %1, %c0_i32_0 : i32
    scf.if %2 {
      %cst_17 = arith.constant 0.000000e+00 : f32
      %27 = vector.broadcast %cst_17 : f32 to vector<12x256xf32>
      %c0_18 = arith.constant 0 : index
      %c0_19 = arith.constant 0 : index
      %28 = vector.load %arg16[%c0_18, %c0_19] : memref<12x256xf32, #tpu.memory_space<vmem>>, vector<12x256xf32>
      tpu.vector_store %arg16[%c0_18, %c0_19], %27 {strides = array<i32>} : memref<12x256xf32, #tpu.memory_space<vmem>>, vector<12x256xf32>,
      %cst_20 = arith.constant 0.000000e+00 : f32
      %29 = vector.broadcast %cst_20 : f32 to vector<12x128xf32>
      %c0_21 = arith.constant 0 : index
      %c0_22 = arith.constant 0 : index
      %30 = vector.load %arg17[%c0_21, %c0_22] : memref<12x128xf32, #tpu.memory_space<vmem>>, vector<12x128xf32>
      tpu.vector_store %arg17[%c0_21, %c0_22], %29 {strides = array<i32>} : memref<12x128xf32, #tpu.memory_space<vmem>>, vector<12x128xf32>,
    } else {
    }
    %c0 = arith.constant 0 : index
    %c0_1 = arith.constant 0 : index
    %c0_2 = arith.constant 0 : index
    %3 = vector.load %arg2[%c0, %c0_1, %c0_2] : memref<12x20x256xbf16, #tpu.memory_space<vmem>>, vector<12x20x256xbf16>
    %4 = arith.extf %3 : vector<12x20x256xbf16> to vector<12x20x256xf32>
    %cst = arith.constant dense<0.000000e+00> : vector<12x20xf32>
    %5 = vector.multi_reduction <add>, %4, %cst [2] : vector<12x20x256xf32> to vector<12x20xf32>
    %6 = vector.shape_cast %5 : vector<12x20xf32> to vector<12x20x1xf32>
    %cst_3 = arith.constant 0.000000e+00 : f32
    %7 = vector.broadcast %cst_3 : f32 to vector<12x20x1xf32>
    %8 = arith.cmpf one, %6, %7 : vector<12x20x1xf32>
    %c0_4 = arith.constant 0 : index
    %c0_5 = arith.constant 0 : index
    %9 = vector.load %arg16[%c0_4, %c0_5] : memref<12x256xf32, #tpu.memory_space<vmem>>, vector<12x256xf32>
    %cst_6 = arith.constant 0.000000e+00 : f32
    %10 = vector.shape_cast %8 : vector<12x20x1xi1> to vector<12x20x1xi1>
    %11 = vector.broadcast %10 : vector<12x20x1xi1> to vector<12x20x256xi1>
    %12 = vector.broadcast %cst_6 : f32 to vector<12x20x256xf32>
    %13 = arith.select %11, %4, %12 : vector<12x20x256xi1>, vector<12x20x256xf32>
    %cst_7 = arith.constant dense<0.000000e+00> : vector<12x256xf32>
    %14 = vector.multi_reduction <add>, %13, %cst_7 [1] : vector<12x20x256xf32> to vector<12x256xf32>
    %15 = arith.addf %9, %14 : vector<12x256xf32>
    %c0_8 = arith.constant 0 : index
    %c0_9 = arith.constant 0 : index
    %16 = vector.load %arg16[%c0_8, %c0_9] : memref<12x256xf32, #tpu.memory_space<vmem>>, vector<12x256xf32>
    tpu.vector_store %arg16[%c0_8, %c0_9], %15 {strides = array<i32>} : memref<12x256xf32, #tpu.memory_space<vmem>>, vector<12x256xf32>,
    %c0_10 = arith.constant 0 : index
    %c0_11 = arith.constant 0 : index
    %17 = vector.load %arg17[%c0_10, %c0_11] : memref<12x128xf32, #tpu.memory_space<vmem>>, vector<12x128xf32>
    %18 = arith.extui %8 : vector<12x20x1xi1> to vector<12x20x1xi32>
    %19 = arith.sitofp %18 : vector<12x20x1xi32> to vector<12x20x1xf32>
    %cst_12 = arith.constant dense<0.000000e+00> : vector<12x1xf32>
    %20 = vector.multi_reduction <add>, %19, %cst_12 [1] : vector<12x20x1xf32> to vector<12x1xf32>
    %21 = vector.broadcast %20 : vector<12x1xf32> to vector<12x128xf32>
    %22 = arith.addf %17, %21 : vector<12x128xf32>
    %c0_13 = arith.constant 0 : index
    %c0_14 = arith.constant 0 : index
    %23 = vector.load %arg17[%c0_13, %c0_14] : memref<12x128xf32, #tpu.memory_space<vmem>>, vector<12x128xf32>
    tpu.vector_store %arg17[%c0_13, %c0_14], %22 {strides = array<i32>} : memref<12x128xf32, #tpu.memory_space<vmem>>, vector<12x128xf32>,
    %c0_i32_15 = arith.constant 0 : i32
    %24 = arith.cmpi eq, %arg1, %c0_i32_15 : i32
    %25 = arith.extui %24 : i1 to i32
    %c0_i32_16 = arith.constant 0 : i32
    %26 = arith.cmpi ne, %25, %c0_i32_16 : i32
    scf.if %26 {
      %c0_17 = arith.constant 0 : index
      %c0_18 = arith.constant 0 : index
      %27 = vector.load %arg16[%c0_17, %c0_18] : memref<12x256xf32, #tpu.memory_space<vmem>>, vector<12x256xf32>
      %c0_19 = arith.constant 0 : index
      %c0_20 = arith.constant 0 : index
      %28 = vector.load %arg17[%c0_19, %c0_20] : memref<12x128xf32, #tpu.memory_space<vmem>>, vector<12x1xf32>
      %cst_21 = arith.constant 1.000000e-10 : f32
      %29 = vector.broadcast %cst_21 : f32 to vector<12x1xf32>
      %30 = arith.addf %28, %29 : vector<12x1xf32>
      %31 = vector.broadcast %30 : vector<12x1xf32> to vector<12x256xf32>
      %32 = arith.divf %27, %31 : vector<12x256xf32>
      %33 = arith.truncf %32 : vector<12x256xf32> to vector<12x256xbf16>
      %c0_22 = arith.constant 0 : index
      %c0_23 = arith.constant 0 : index
      %34 = vector.load %arg3[%c0_22, %c0_23] : memref<256x128xbf16, #tpu.memory_space<vmem>>, vector<256x128xbf16>
      %cst_24 = arith.constant dense<0.000000e+00> : vector<12x128xf32>
      %35 = tpu.matmul %33, %34, %cst_24 {dimension_numbers = #tpu.dot_dimension_numbers<[1], [0], [0], [1], [0, 0, 1, 1], [], []>} : vector<12x256xbf16>, vector<256x128xbf16>, vector<12x128xf32> -> vector<12x128xf32>
      %c0_25 = arith.constant 0 : index
      %c0_26 = arith.constant 0 : index
      %36 = vector.load %arg4[%c0_25, %c0_26] : memref<1x128xf32, #tpu.memory_space<vmem>>, vector<1x128xf32>
      %37 = vector.broadcast %36 : vector<1x128xf32> to vector<12x128xf32>
      %38 = arith.addf %35, %37 : vector<12x128xf32>
      %c0_27 = arith.constant 0 : index
      %c0_28 = arith.constant 0 : index
      %39 = vector.load %arg5[%c0_27, %c0_28] : memref<1x128xf32, #tpu.memory_space<vmem>>, vector<1x128xf32>
      %c0_29 = arith.constant 0 : index
      %c0_30 = arith.constant 0 : index
      %40 = vector.load %arg6[%c0_29, %c0_30] : memref<1x128xf32, #tpu.memory_space<vmem>>, vector<1x128xf32>
      %cst_31 = arith.constant dense<0.000000e+00> : vector<12xf32>
      %41 = vector.multi_reduction <add>, %38, %cst_31 [1] : vector<12x128xf32> to vector<12xf32>
      %42 = vector.shape_cast %41 : vector<12xf32> to vector<12x1xf32>
      %cst_32 = arith.constant 1.280000e+02 : f32
      %43 = vector.broadcast %cst_32 : f32 to vector<12x1xf32>
      %44 = arith.divf %42, %43 : vector<12x1xf32>
      %45 = vector.broadcast %44 : vector<12x1xf32> to vector<12x128xf32>
      %46 = arith.subf %38, %45 : vector<12x128xf32>
      %47 = arith.mulf %46, %46 : vector<12x128xf32>
      %cst_33 = arith.constant dense<0.000000e+00> : vector<12xf32>
      %48 = vector.multi_reduction <add>, %47, %cst_33 [1] : vector<12x128xf32> to vector<12xf32>
      %49 = vector.shape_cast %48 : vector<12xf32> to vector<12x1xf32>
      %cst_34 = arith.constant 1.280000e+02 : f32
      %50 = vector.broadcast %cst_34 : f32 to vector<12x1xf32>
      %51 = arith.divf %49, %50 : vector<12x1xf32>
      %52 = vector.broadcast %44 : vector<12x1xf32> to vector<12x128xf32>
      %53 = arith.subf %38, %52 : vector<12x128xf32>
      %cst_35 = arith.constant 9.99999974E-6 : f32
      %54 = vector.broadcast %cst_35 : f32 to vector<12x1xf32>
      %55 = arith.addf %51, %54 : vector<12x1xf32>
      %56 = math.rsqrt %55 : vector<12x1xf32>
      %57 = vector.broadcast %56 : vector<12x1xf32> to vector<12x128xf32>
      %58 = arith.mulf %53, %57 : vector<12x128xf32>
      %59 = vector.broadcast %39 : vector<1x128xf32> to vector<12x128xf32>
      %60 = arith.mulf %58, %59 : vector<12x128xf32>
      %61 = vector.broadcast %40 : vector<1x128xf32> to vector<12x128xf32>
      %62 = arith.addf %60, %61 : vector<12x128xf32>
      %cst_36 = arith.constant 0.000000e+00 : f32
      %63 = vector.broadcast %cst_36 : f32 to vector<12x128xf32>
      %64 = arith.maximumf %62, %63 : vector<12x128xf32>
      %65 = arith.truncf %64 : vector<12x128xf32> to vector<12x128xbf16>
      %c0_37 = arith.constant 0 : index
      %c0_38 = arith.constant 0 : index
      %66 = vector.load %arg7[%c0_37, %c0_38] : memref<128x128xbf16, #tpu.memory_space<vmem>>, vector<128x128xbf16>
      %cst_39 = arith.constant dense<0.000000e+00> : vector<12x128xf32>
      %67 = tpu.matmul %65, %66, %cst_39 {dimension_numbers = #tpu.dot_dimension_numbers<[1], [0], [0], [1], [0, 0, 1, 1], [], []>} : vector<12x128xbf16>, vector<128x128xbf16>, vector<12x128xf32> -> vector<12x128xf32>
      %c0_40 = arith.constant 0 : index
      %c0_41 = arith.constant 0 : index
      %68 = vector.load %arg8[%c0_40, %c0_41] : memref<1x128xf32, #tpu.memory_space<vmem>>, vector<1x128xf32>
      %69 = vector.broadcast %68 : vector<1x128xf32> to vector<12x128xf32>
      %70 = arith.addf %67, %69 : vector<12x128xf32>
      %c0_42 = arith.constant 0 : index
      %c0_43 = arith.constant 0 : index
      %71 = vector.load %arg9[%c0_42, %c0_43] : memref<1x128xf32, #tpu.memory_space<vmem>>, vector<1x128xf32>
      %c0_44 = arith.constant 0 : index
      %c0_45 = arith.constant 0 : index
      %72 = vector.load %arg10[%c0_44, %c0_45] : memref<1x128xf32, #tpu.memory_space<vmem>>, vector<1x128xf32>
      %cst_46 = arith.constant dense<0.000000e+00> : vector<12xf32>
      %73 = vector.multi_reduction <add>, %70, %cst_46 [1] : vector<12x128xf32> to vector<12xf32>
      %74 = vector.shape_cast %73 : vector<12xf32> to vector<12x1xf32>
      %cst_47 = arith.constant 1.280000e+02 : f32
      %75 = vector.broadcast %cst_47 : f32 to vector<12x1xf32>
      %76 = arith.divf %74, %75 : vector<12x1xf32>
      %77 = vector.broadcast %76 : vector<12x1xf32> to vector<12x128xf32>
      %78 = arith.subf %70, %77 : vector<12x128xf32>
      %79 = arith.mulf %78, %78 : vector<12x128xf32>
      %cst_48 = arith.constant dense<0.000000e+00> : vector<12xf32>
      %80 = vector.multi_reduction <add>, %79, %cst_48 [1] : vector<12x128xf32> to vector<12xf32>
      %81 = vector.shape_cast %80 : vector<12xf32> to vector<12x1xf32>
      %cst_49 = arith.constant 1.280000e+02 : f32
      %82 = vector.broadcast %cst_49 : f32 to vector<12x1xf32>
      %83 = arith.divf %81, %82 : vector<12x1xf32>
      %84 = vector.broadcast %76 : vector<12x1xf32> to vector<12x128xf32>
      %85 = arith.subf %70, %84 : vector<12x128xf32>
      %cst_50 = arith.constant 9.99999974E-6 : f32
      %86 = vector.broadcast %cst_50 : f32 to vector<12x1xf32>
      %87 = arith.addf %83, %86 : vector<12x1xf32>
      %88 = math.rsqrt %87 : vector<12x1xf32>
      %89 = vector.broadcast %88 : vector<12x1xf32> to vector<12x128xf32>
      %90 = arith.mulf %85, %89 : vector<12x128xf32>
      %91 = vector.broadcast %71 : vector<1x128xf32> to vector<12x128xf32>
      %92 = arith.mulf %90, %91 : vector<12x128xf32>
      %93 = vector.broadcast %72 : vector<1x128xf32> to vector<12x128xf32>
      %94 = arith.addf %92, %93 : vector<12x128xf32>
      %cst_51 = arith.constant 0.000000e+00 : f32
      %95 = vector.broadcast %cst_51 : f32 to vector<12x128xf32>
      %96 = arith.maximumf %94, %95 : vector<12x128xf32>
      %97 = arith.truncf %96 : vector<12x128xf32> to vector<12x128xbf16>
      %c0_52 = arith.constant 0 : index
      %c0_53 = arith.constant 0 : index
      %98 = vector.load %arg11[%c0_52, %c0_53] : memref<128x256xbf16, #tpu.memory_space<vmem>>, vector<128x256xbf16>
      %cst_54 = arith.constant dense<0.000000e+00> : vector<12x256xf32>
      %99 = tpu.matmul %97, %98, %cst_54 {dimension_numbers = #tpu.dot_dimension_numbers<[1], [0], [0], [1], [0, 0, 1, 1], [], []>} : vector<12x128xbf16>, vector<128x256xbf16>, vector<12x256xf32> -> vector<12x256xf32>
      %c0_55 = arith.constant 0 : index
      %c0_56 = arith.constant 0 : index
      %100 = vector.load %arg12[%c0_55, %c0_56] : memref<1x256xf32, #tpu.memory_space<vmem>>, vector<1x256xf32>
      %101 = vector.broadcast %100 : vector<1x256xf32> to vector<12x256xf32>
      %102 = arith.addf %99, %101 : vector<12x256xf32>
      %c0_57 = arith.constant 0 : index
      %c0_58 = arith.constant 0 : index
      %103 = vector.load %arg13[%c0_57, %c0_58] : memref<1x256xf32, #tpu.memory_space<vmem>>, vector<1x256xf32>
      %c0_59 = arith.constant 0 : index
      %c0_60 = arith.constant 0 : index
      %104 = vector.load %arg14[%c0_59, %c0_60] : memref<1x256xf32, #tpu.memory_space<vmem>>, vector<1x256xf32>
      %cst_61 = arith.constant dense<0.000000e+00> : vector<12xf32>
      %105 = vector.multi_reduction <add>, %102, %cst_61 [1] : vector<12x256xf32> to vector<12xf32>
      %106 = vector.shape_cast %105 : vector<12xf32> to vector<12x1xf32>
      %cst_62 = arith.constant 2.560000e+02 : f32
      %107 = vector.broadcast %cst_62 : f32 to vector<12x1xf32>
      %108 = arith.divf %106, %107 : vector<12x1xf32>
      %109 = vector.broadcast %108 : vector<12x1xf32> to vector<12x256xf32>
      %110 = arith.subf %102, %109 : vector<12x256xf32>
      %111 = arith.mulf %110, %110 : vector<12x256xf32>
      %cst_63 = arith.constant dense<0.000000e+00> : vector<12xf32>
      %112 = vector.multi_reduction <add>, %111, %cst_63 [1] : vector<12x256xf32> to vector<12xf32>
      %113 = vector.shape_cast %112 : vector<12xf32> to vector<12x1xf32>
      %cst_64 = arith.constant 2.560000e+02 : f32
      %114 = vector.broadcast %cst_64 : f32 to vector<12x1xf32>
      %115 = arith.divf %113, %114 : vector<12x1xf32>
      %116 = vector.broadcast %108 : vector<12x1xf32> to vector<12x256xf32>
      %117 = arith.subf %102, %116 : vector<12x256xf32>
      %cst_65 = arith.constant 9.99999974E-6 : f32
      %118 = vector.broadcast %cst_65 : f32 to vector<12x1xf32>
      %119 = arith.addf %115, %118 : vector<12x1xf32>
      %120 = math.rsqrt %119 : vector<12x1xf32>
      %121 = vector.broadcast %120 : vector<12x1xf32> to vector<12x256xf32>
      %122 = arith.mulf %117, %121 : vector<12x256xf32>
      %123 = vector.broadcast %103 : vector<1x256xf32> to vector<12x256xf32>
      %124 = arith.mulf %122, %123 : vector<12x256xf32>
      %125 = vector.broadcast %104 : vector<1x256xf32> to vector<12x256xf32>
      %126 = arith.addf %124, %125 : vector<12x256xf32>
      %c0_66 = arith.constant 0 : index
      %c0_67 = arith.constant 0 : index
      %127 = vector.load %arg15[%c0_66, %c0_67] : memref<12x256xf32, #tpu.memory_space<vmem>>, vector<12x256xf32>
      tpu.vector_store %arg15[%c0_66, %c0_67], %126 {strides = array<i32>} : memref<12x256xf32, #tpu.memory_space<vmem>>, vector<12x256xf32>,
    } else {
    }
    return
  }
  func.func @transform_0(%arg0: i32, %arg1: i32) -> (i32, i32, i32) {
    %c0_i32 = arith.constant 0 : i32
    %c0_i32_0 = arith.constant 0 : i32
    return %arg0, %arg1, %c0_i32 : i32, i32, i32
  }
  func.func @transform_1(%arg0: i32, %arg1: i32) -> (i32, i32) {
    %c0_i32 = arith.constant 0 : i32
    %c0_i32_0 = arith.constant 0 : i32
    %c0_i32_1 = arith.constant 0 : i32
    return %c0_i32, %c0_i32_0 : i32, i32
  }
  func.func @transform_2(%arg0: i32, %arg1: i32) -> (i32, i32) {
    %c0_i32 = arith.constant 0 : i32
    %c0_i32_0 = arith.constant 0 : i32
    %c0_i32_1 = arith.constant 0 : i32
    return %c0_i32, %c0_i32_0 : i32, i32
  }
  func.func @transform_3(%arg0: i32, %arg1: i32) -> (i32, i32) {
    %c0_i32 = arith.constant 0 : i32
    %c0_i32_0 = arith.constant 0 : i32
    %c0_i32_1 = arith.constant 0 : i32
    return %c0_i32, %c0_i32_0 : i32, i32
  }
  func.func @transform_4(%arg0: i32, %arg1: i32) -> (i32, i32) {
    %c0_i32 = arith.constant 0 : i32
    %c0_i32_0 = arith.constant 0 : i32
    %c0_i32_1 = arith.constant 0 : i32
    return %c0_i32, %c0_i32_0 : i32, i32
  }
  func.func @transform_5(%arg0: i32, %arg1: i32) -> (i32, i32) {
    %c0_i32 = arith.constant 0 : i32
    %c0_i32_0 = arith.constant 0 : i32
    %c0_i32_1 = arith.constant 0 : i32
    return %c0_i32, %c0_i32_0 : i32, i32
  }
  func.func @transform_6(%arg0: i32, %arg1: i32) -> (i32, i32) {
    %c0_i32 = arith.constant 0 : i32
    %c0_i32_0 = arith.constant 0 : i32
    %c0_i32_1 = arith.constant 0 : i32
    return %c0_i32, %c0_i32_0 : i32, i32
  }
  func.func @transform_7(%arg0: i32, %arg1: i32) -> (i32, i32) {
    %c0_i32 = arith.constant 0 : i32
    %c0_i32_0 = arith.constant 0 : i32
    %c0_i32_1 = arith.constant 0 : i32
    return %c0_i32, %c0_i32_0 : i32, i32
  }
  func.func @transform_8(%arg0: i32, %arg1: i32) -> (i32, i32) {
    %c0_i32 = arith.constant 0 : i32
    %c0_i32_0 = arith.constant 0 : i32
    %c0_i32_1 = arith.constant 0 : i32
    return %c0_i32, %c0_i32_0 : i32, i32
  }
  func.func @transform_9(%arg0: i32, %arg1: i32) -> (i32, i32) {
    %c0_i32 = arith.constant 0 : i32
    %c0_i32_0 = arith.constant 0 : i32
    %c0_i32_1 = arith.constant 0 : i32
    return %c0_i32, %c0_i32_0 : i32, i32
  }
  func.func @transform_10(%arg0: i32, %arg1: i32) -> (i32, i32) {
    %c0_i32 = arith.constant 0 : i32
    %c0_i32_0 = arith.constant 0 : i32
    %c0_i32_1 = arith.constant 0 : i32
    return %c0_i32, %c0_i32_0 : i32, i32
  }
  func.func @transform_11(%arg0: i32, %arg1: i32) -> (i32, i32) {
    %c0_i32 = arith.constant 0 : i32
    %c0_i32_0 = arith.constant 0 : i32
    %c0_i32_1 = arith.constant 0 : i32
    return %c0_i32, %c0_i32_0 : i32, i32
  }
  func.func @transform_12(%arg0: i32, %arg1: i32) -> (i32, i32) {
    %c0_i32 = arith.constant 0 : i32
    %c0_i32_0 = arith.constant 0 : i32
    %c0_i32_1 = arith.constant 0 : i32
    return %c0_i32, %c0_i32_0 : i32, i32
  }
  func.func @transform_13(%arg0: i32, %arg1: i32) -> (i32, i32) {
    %c0_i32 = arith.constant 0 : i32
    %c0_i32_0 = arith.constant 0 : i32
    return %arg0, %c0_i32 : i32, i32
  }
}

</mosaic_0001>

<bundles_post_ra>
// kernel: user_embedding_forward.1
= control target key start
LH: loop header
LB: loop body
LE: loop exit
PB: predicated region body
PF: predicated region fallthrough
CT: control target
= control target key end

     0   :  { %18 = vsyncpa [#allocation5], 0  ;;  %s3169_s0 = inlined_call_operand.hbm [shape: bf16[12,20,256], index: 0, kind: input, shape index: {}]   ;;  %s3170_s1 = inlined_call_operand.hbm [shape: bf16[256,128], index: 1, kind: input, shape index: {}]   ;;  %s3171_s2 = inlined_call_operand.hbm [shape: f32[1,128], index: 2, kind: input, shape index: {}]   ;;  %s3172_s3 = inlined_call_operand.vmem [shape: f32[1,128], index: 3, kind: input, shape index: {}]   ;;  %s3173_s4 = inlined_call_operand.hbm [shape: f32[1,128], index: 4, kind: input, shape index: {}]   ;;  %s3174_s5 = inlined_call_operand.hbm [shape: bf16[128,128], index: 5, kind: input, shape index: {}]   ;;  %s3175_s6 = inlined_call_operand.hbm [shape: f32[1,128], index: 6, kind: input, shape index: {}]   ;;  %s3176_s7 = inlined_call_operand.vmem [shape: f32[1,128], index: 7, kind: input, shape index: {}]   ;;  %s3177_s8 = inlined_call_operand.hbm [shape: f32[1,128], index: 8, kind: input, shape index: {}]   ;;  %s3178_s9 = inlined_call_operand.hbm [shape: bf16[128,256], index: 9, kind: input, shape index: {}]   ;;  %s3179_s10 = inlined_call_operand.vmem [shape: f32[1,256], index: 10, kind: input, shape index: {}]   ;;  %s3180_s11 = inlined_call_operand.vmem [shape: f32[1,256], index: 11, kind: input, shape index: {}]   ;;  %s3181_s12 = inlined_call_operand.hbm [shape: f32[1,256], index: 12, kind: input, shape index: {}]   ;;  %s3182_s13 = inlined_call_operand.hbm [shape: f32[12,256], index: 13, kind: output, shape index: {}]  }
   0x1   :  { %19 = vsyncpa [#allocation8], 0 }
   0x2   :  { %20 = vsyncpa [#allocation11], 0 }
   0x3   :  { %21 = vsyncpa [#allocation14], 0 }
   0x4   :  { %22 = vsyncpa [#allocation17], 0  ;;  %s41_s27 = sshll.u32 %s3170_s1, 4  ;;  %s42_s27 = int_to_ptr.hbm [resolvable:$true] %s41_s27 }
   0x5   :  { %23 = vsyncpa [#allocation6], 0  ;;  %s2255_s28 = smov [#allocation7]   ;;  %s68_s15 = sshll.u32 %s3173_s4, 4  ;;  %s69_s15 = int_to_ptr.hbm [resolvable:$true] %s68_s15 }
   0x6   :  { %s43_s29 = sshll.u32 %s2255_s28, 4  ;;  %s2256_s16 = smov 64   ;;  %s44_s29 = int_to_ptr.vmem [resolvable:$true] %s43_s29 }
   0x7   :  { %s2257_s17 = smov 4   ;;  %s2258_s18 = smov [#allocation10]  }
   0x8   :  { %49 = dma.hbm_to_vmem [thread:$0]  %s42_s27, 2048, %s44_s29, [#allocation8], %s2256_s16, %s2256_s16, %s2257_s17  }
   0x9   :  { %s70_s19 = sshll.u32 %s2258_s18, 4  ;;  %s92_s21 = sshll.u32 %s3175_s6, 4  ;;  %s71_s19 = int_to_ptr.vmem [resolvable:$true] %s70_s19  ;;  %s93_s21 = int_to_ptr.hbm [resolvable:$true] %s92_s21 }
   0xa   :  { %73 = dma.hbm_to_vmem [thread:$0]  %s69_s15, 16, %s71_s19, [#allocation11]  }
   0xb   :  { %s2259_s22 = smov [#allocation13]   ;;  %s115_s25 = sshll.u32 %s3178_s9, 4  ;;  %s116_s25 = int_to_ptr.hbm [resolvable:$true] %s115_s25 }
   0xc   :  { %s94_s23 = sshll.u32 %s2259_s22, 4  ;;  %s2260_s26 = smov [#allocation16]   ;;  %s95_s23 = int_to_ptr.vmem [resolvable:$true] %s94_s23 }
   0xd   :  { %97 = dma.hbm_to_vmem [thread:$0]  %s93_s21, 16, %s95_s23, [#allocation14]  }
   0xe   :  { %s117_s27 = sshll.u32 %s2260_s26, 4  ;;  %s28_s30 = sshll.u32 %s3169_s0, 4  ;;  %s118_s27 = int_to_ptr.vmem [resolvable:$true] %s117_s27  ;;  %s29_s30 = int_to_ptr.hbm [resolvable:$true] %s28_s30 }
   0xf   :  { %s2261_s6 = smov 128   ;;  %s2262_s14 = smov 8  }
  0x10   :  { %123 = dma.hbm_to_vmem [thread:$0]  %s116_s25, 2048, %s118_s27, [#allocation17], %s2261_s6, %s2261_s6, %s2262_s14  }
  0x11   :  { %s55_s19 = sshll.u32 %s3171_s2, 4  ;;  %s2263_s20 = smov [#allocation4]   ;;  %s56_s19 = int_to_ptr.hbm [resolvable:$true] %s55_s19 }
  0x12   :  { %s30_s1 = sshll.u32 %s2263_s20, 4  ;;  %s2264_s9 = smov [#allocation9]   ;;  %s31_s1 = int_to_ptr.vmem [resolvable:$true] %s30_s1 }
  0x13   :  { %36 = dma.hbm_to_vmem [thread:$0]  %s29_s30, 4608, %s31_s1, [#allocation5], %s2261_s6, %s2261_s6, %s2262_s14  }
  0x14   :  { %s57_s21 = sshll.u32 %s2264_s9, 4  ;;  %s78_s0 = sshll.u32 %s3174_s5, 4  ;;  %s58_s21 = int_to_ptr.vmem [resolvable:$true] %s57_s21  ;;  %s79_s0 = int_to_ptr.hbm [resolvable:$true] %s78_s0 }
  0x15   :  { %60 = dma.hbm_to_vmem [thread:$0]  %s56_s19, 16, %s58_s21, [#allocation8]  }
  0x16   :  { %s105_s25 = sshll.u32 %s3177_s8, 4  ;;  %s2265_s26 = smov [#allocation12]   ;;  %s106_s25 = int_to_ptr.hbm [resolvable:$true] %s105_s25 }
  0x17   :  { %s80_s2 = sshll.u32 %s2265_s26, 4  ;;  %s2266_s27 = smov [#allocation15]   ;;  %s81_s2 = int_to_ptr.vmem [resolvable:$true] %s80_s2 }
  0x18   :  { %86 = dma.hbm_to_vmem [thread:$0]  %s79_s0, 1024, %s81_s2, [#allocation11], %s2256_s16, %s2256_s16, %s2257_s17  }
  0x19   :  { %s107_s28 = sshll.u32 %s2266_s27, 4  ;;  %s133_s5 = sshll.u32 %s3181_s12, 4  ;;  %s108_s28 = int_to_ptr.vmem [resolvable:$true] %s107_s28  ;;  %s134_s5 = int_to_ptr.hbm [resolvable:$true] %s133_s5 }
  0x1a   :  { %110 = dma.hbm_to_vmem [thread:$0]  %s106_s25, 16, %s108_s28, [#allocation14]  }
  0x1b   :  { %s2267_s6 = smov [#allocation18]  }
  0x1c   :  { %s135_s14 = sshll.u32 %s2267_s6, 4  ;;  %s136_s14 = int_to_ptr.vmem [resolvable:$true] %s135_s14 }
  0x1d   :  { %138 = dma.hbm_to_vmem [thread:$0]  %s134_s5, 32, %s136_s14, [#allocation17]  }
  0x1e   :  { %2243 = dma.done.wait [#allocation5], 4608  }
  0x1f   :  { %2244 = vsyncadd [#allocation5], 4294962688 }
  0x20   :  { %2245 = dma.done.wait [#allocation8], 2064  }
  0x21   :  { %2246 = vsyncadd [#allocation8], 4294965232 }
  0x22   :  { %2247 = dma.done.wait [#allocation11], 1040  }
  0x23   :  { %2248 = vsyncadd [#allocation11], 4294966256 }
  0x24   :  { %2249 = dma.done.wait [#allocation14], 32  }
  0x25   :  { %2250 = vsyncadd [#allocation14], 4294967264 }
  0x26   :  { %2251 = dma.done.wait [#allocation17], 2080  }
  0x27   :  { %2252 = vsyncadd [#allocation17], 4294965216  ;;  %v2378_v0 = vld [vmem:[#allocation4 + $0x18] sm:$0xff]  ;;  %v2380_v1 = vld [vmem:[#allocation4] sm:$0xff]  ;;  %vm299_vm0 = vcmask 1043456   ;;  %vm850_vm8 = vcmask 1041409  }
  0x28   :  { %v2382_v2 = vld [vmem:[#allocation4 + $0x10] sm:$0x33]  ;;  %v227_v3 = vunpack.c.l.bf16 %v2378_v0  ;;  %v228_v4 = vunpack.c.h.bf16 %v2378_v0  ;;  %v221_v5 = vunpack.c.l.bf16 %v2380_v1  ;;  %v222_v6 = vunpack.c.h.bf16 %v2380_v1  ;;  %v2388_v7 = vld [vmem:[#allocation4 + $0x20] sm:$0xff]  ;;  %v2390_v8 = vld [vmem:[#allocation4 + $0x28] sm:$0x33]  ;;  %s1702_s1 = sshll.u32 %s3182_s13, 4  ;;  %s1703_s1 = int_to_ptr.hbm [resolvable:$true] %s1702_s1 }
  0x29   :  { %v225_v9 = vunpack.c.l.bf16 %v2382_v2  ;;  %v226_v10 = vunpack.c.h.bf16 %v2382_v2  ;;  %v2394_v11 = vld [vmem:[#allocation4 + $0x8] sm:$0xff]  ;;  %v229_v14 = vunpack.c.l.bf16 %v2388_v7  ;;  %v230_v17 = vunpack.c.h.bf16 %v2388_v7  ;;  %v2430_v27 = vld [vmem:[#allocation4 + $0x40] sm:$0x33]  ;;  %v2432_v28 = vld [vmem:[#allocation4 + $0x38] sm:$0xff]  ;;  %s2273_s9 = smov 256   ;;  %s2274_s21 = smov 16  }
  0x2a   :  { %v305_v12 = vadd.f32 %v228_v4, %v227_v3  ;;  %v293_v13 = vadd.f32 %v222_v6, %v221_v5  ;;  %v231_v18 = vunpack.c.l.bf16 %v2390_v8  ;;  %v223_v20 = vunpack.c.l.bf16 %v2394_v11  ;;  %v2434_v29 = vld [vmem:[#allocation4 + $0x30] sm:$0xff]  ;;  %v2456_v41 = vld [vmem:[#allocation4 + $0x58] sm:$0x33]  ;;  %v2460_v43 = vld [vmem:[#allocation4 + $0x48] sm:$0xff] }
  0x2b   :  { %v300_v15 = vsel %vm299_vm0, %v225_v9, 0.0  ;;  %v301_v16 = vsel %vm299_vm0, %v226_v10, 0.0  ;;  %v224_v21 = vunpack.c.h.bf16 %v2394_v11  ;;  %v232_v22 = vunpack.c.h.bf16 %v2390_v8  ;;  %v2458_v42 = vld [vmem:[#allocation4 + $0x50] sm:$0xff]  ;;  %v2484_v56 = vld [vmem:[#allocation4 + $0x68] sm:$0xff]  ;;  %v2486_v57 = vld [vmem:[#allocation4 + $0x60] sm:$0xff] }
  0x2c   :  { %306 = vadd.xlane.f32.xlu1 %v305_v12  ;;  %294 = vadd.xlane.f32.xlu0 %v293_v13  ;;  %v302_v19 = vadd.f32 %v301_v16, %v300_v15  ;;  %v311_v23 = vsel %vm299_vm0, %v231_v18, 0.0  ;;  %v308_v25 = vadd.f32 %v230_v17, %v229_v14  ;;  %v3227_v31 = vunpack.c.l.bf16 %v2430_v27  ;;  %v2482_v55 = vld [vmem:[#allocation4 + $0x70] sm:$0x33] }
  0x2d   :  { %v312_v24 = vsel %vm299_vm0, %v232_v22, 0.0  ;;  %v296_v26 = vadd.f32 %v224_v21, %v223_v20  ;;  %v3225_v32 = vunpack.c.h.bf16 %v2430_v27  ;;  %v235_v33 = vunpack.c.l.bf16 %v2432_v28 }
  0x2e   :  { %303 = vadd.xlane.f32.xlu2 %v302_v19  ;;  %v313_v30 = vadd.f32 %v312_v24, %v311_v23  ;;  %v3237_v34 = vunpack.c.h.bf16 %v2432_v28  ;;  %v3232_v35 = vunpack.c.l.bf16 %v2434_v29  ;;  %v3231_v36 = vunpack.c.h.bf16 %v2434_v29  ;;  %v2508_v23 = vld [vmem:[#allocation4 + $0x80] sm:$0xff]  ;;  %v2510_v24 = vld [vmem:[#allocation4 + $0x78] sm:$0xff] }
  0x2f   :  { %v322_v37 = vsel %vm299_vm0, %v3227_v31, 0.0  ;;  %v323_v38 = vsel %vm299_vm0, %v3225_v32, 0.0  ;;  %v3211_v45 = vunpack.c.l.bf16 %v2456_v41  ;;  %v3210_v46 = vunpack.c.h.bf16 %v2456_v41  ;;  %v2663_v32 = vld [vmem:[#allocation4 + $0x118] sm:$0x33] }
  0x30   :  { %v319_v39 = vadd.f32 %v3237_v34, %v235_v33  ;;  %v316_v40 = vadd.f32 %v3231_v36, %v3232_v35  ;;  %v324_v44 = vadd.f32 %v323_v38, %v322_v37  ;;  %v3222_v47 = vunpack.c.l.bf16 %v2458_v42 }
  0x31   :  { %v3218_v48 = vunpack.c.h.bf16 %v2458_v42  ;;  %v3216_v49 = vunpack.c.l.bf16 %v2460_v43  ;;  %v3213_v50 = vunpack.c.h.bf16 %v2460_v43  ;;  %v333_v51 = vsel %vm299_vm0, %v3211_v45, 0.0  ;;  %v2612_v45 = vld [vmem:[#allocation4 + $0xf8] sm:$0xff] }
  0x32   :  { %v334_v52 = vsel %vm299_vm0, %v3210_v46, 0.0  ;;  %v3194_v59 = vunpack.c.l.bf16 %v2482_v55  ;;  %v3189_v60 = vunpack.c.h.bf16 %v2482_v55  ;;  %v3202_v61 = vunpack.c.l.bf16 %v2484_v56 }
  0x33   :  { %v330_v53 = vadd.f32 %v3218_v48, %v3222_v47  ;;  %v327_v54 = vadd.f32 %v3213_v50, %v3216_v49  ;;  %v335_v58 = vadd.f32 %v334_v52, %v333_v51  ;;  %v3201_v62 = vunpack.c.h.bf16 %v2484_v56  ;;  %v2639_v48 = vld [vmem:[#allocation4 + $0xb0] sm:$0xff] }
  0x34   :  { %309 = vadd.xlane.f32.xlu1 %v308_v25  ;;  %297 = vadd.xlane.f32.xlu0 %v296_v26  ;;  %v3199_v63 = vunpack.c.l.bf16 %v2486_v57  ;;  %v3197_v12 = vunpack.c.h.bf16 %v2486_v57  ;;  %v344_v13 = vsel %vm299_vm0, %v3194_v59, 0.0  ;;  %v345_v15 = vsel %vm299_vm0, %v3189_v60, 0.0  ;;  %v2512_v26 = vld [vmem:[#allocation4 + $0xc0] sm:$0xff]  ;;  %v2562_v60 = vld [vmem:[#allocation4 + $0x98] sm:$0xff] }
  0x35   :  { %v341_v16 = vadd.f32 %v3201_v62, %v3202_v61  ;;  %v346_v25 = vadd.f32 %v345_v15, %v344_v13  ;;  %v3184_v37 = vunpack.c.h.bf16 %v2508_v23  ;;  %v3185_v38 = vunpack.c.l.bf16 %v2510_v24  ;;  %v2536_v13 = vld [vmem:[#allocation4 + $0xe0] sm:$0xff]  ;;  %v2590_v61 = vld [vmem:[#allocation4 + $0xf0] sm:$0xff] }
  0x36   :  { %314 = vadd.xlane.f32.xlu2 %v313_v30  ;;  %v338_v19 = vadd.f32 %v3197_v12, %v3199_v63  ;;  %v3188_v30 = vunpack.c.l.bf16 %v2508_v23  ;;  %v3205_v59 = vunpack.c.l.bf16 %v2562_v60  ;;  %vm852_vm15 = vcmask 1042434  }
  0x38   :  { %v352_v51 = vadd.f32 %v3184_v37, %v3188_v30  ;;  %v3195_v37 = vunpack.c.h.bf16 %v2536_v13 }
  0x3c   :  { %320 = vadd.xlane.f32.xlu1 %v319_v39  ;;  %317 = vadd.xlane.f32.xlu0 %v316_v40  ;;  %v3183_v39 = vunpack.c.h.bf16 %v2510_v24  ;;  %v3187_v40 = vunpack.c.l.bf16 %v2512_v26 }
  0x3e   :  { %325 = vadd.xlane.f32.xlu2 %v324_v44  ;;  %v3186_v44 = vunpack.c.h.bf16 %v2512_v26  ;;  %v349_v52 = vadd.f32 %v3183_v39, %v3185_v38  ;;  %v3196_v39 = vunpack.c.l.bf16 %v2536_v13  ;;  %v2544_v38 = vld [vmem:[#allocation4 + $0x88] sm:$0x33] }
  0x40   :  { %v396_v30 = vadd.f32 %v3195_v37, %v3196_v39  ;;  %v3204_v37 = vunpack.c.h.bf16 %v2562_v60  ;;  %v2574_v39 = vld [vmem:[#allocation4 + $0xe8] sm:$0x33] }
  0x41   :  { %v3208_v63 = vunpack.c.h.bf16 %v2574_v39 }
  0x42   :  { %v363_v62 = vadd.f32 %v3204_v37, %v3205_v59  ;;  %v2606_v59 = vld [vmem:[#allocation4 + $0xa0] sm:$0x33] }
  0x43   :  { %v3219_v46 = vunpack.c.h.bf16 %v2606_v59 }
  0x44   :  { %331 = vadd.xlane.f32.xlu1 %v330_v53  ;;  %328 = vadd.xlane.f32.xlu0 %v327_v54  ;;  %v2528_v53 = vld [vmem:[#allocation4 + $0xd8] sm:$0xff]  ;;  %v2530_v54 = vld [vmem:[#allocation4 + $0xc8] sm:$0xff] }
  0x45   :  { %v3191_v15 = vunpack.c.l.bf16 %v2528_v53 }
  0x46   :  { %336 = vadd.xlane.f32.xlu2 %v335_v58  ;;  %v382_v58 = vadd.f32 %v3186_v44, %v3187_v40  ;;  %v2554_v44 = vld [vmem:[#allocation4 + $0x90] sm:$0xff]  ;;  %v3200_v40 = vunpack.c.h.bf16 %v2544_v38 }
  0x4c   :  { %342 = vadd.xlane.f32.xlu1 %v341_v16  ;;  %339 = vadd.xlane.f32.xlu0 %v338_v19  ;;  %v3190_v16 = vunpack.c.h.bf16 %v2528_v53  ;;  %v3193_v19 = vunpack.c.l.bf16 %v2530_v54 }
  0x4e   :  { %347 = vadd.xlane.f32.xlu2 %v346_v25  ;;  %v3192_v25 = vunpack.c.h.bf16 %v2530_v54 }
  0x54   :  { %353 = vadd.xlane.f32.xlu1 %v352_v51  ;;  %350 = vadd.xlane.f32.xlu0 %v349_v52  ;;  %v393_v51 = vadd.f32 %v3190_v16, %v3191_v15  ;;  %v385_v52 = vadd.f32 %v3192_v25, %v3193_v19  ;;  %v3206_v16 = vunpack.c.l.bf16 %v2554_v44  ;;  %v3203_v15 = vunpack.c.h.bf16 %v2554_v44 }
  0x55   :  { %v356_v19 = vsel %vm299_vm0, %v3200_v40, 0.0 }
  0x56   :  { %383 = vadd.xlane.f32.xlu2 %v382_v58  ;;  %v3198_v58 = vunpack.c.l.bf16 %v2544_v38 }
  0x58   :  { %v355_v25 = vsel %vm299_vm0, %v3198_v58, 0.0  ;;  %v3207_v58 = vunpack.c.l.bf16 %v2574_v39 }
  0x59   :  { %v357_v12 = vadd.f32 %v356_v19, %v355_v25  ;;  %v400_v25 = vsel %vm299_vm0, %v3208_v63, 0.0 }
  0x5a   :  { %v399_v19 = vsel %vm299_vm0, %v3207_v58, 0.0 }
  0x5b   :  { %v401_v58 = vadd.f32 %v400_v25, %v399_v19  ;;  %v367_v25 = vsel %vm299_vm0, %v3219_v46, 0.0  ;;  %v2645_v46 = vld [vmem:[#allocation4 + $0x108] sm:$0xff] }
  0x5c   :  { %394 = vadd.xlane.f32.xlu1 %v393_v51  ;;  %386 = vadd.xlane.f32.xlu0 %v385_v52  ;;  %v2576_v51 = vld [vmem:[#allocation4 + $0xd0] sm:$0x33]  ;;  %v360_v52 = vadd.f32 %v3203_v15, %v3206_v16  ;;  %v2268_v16 = vmov 0.0   ;;  %v3234_v47 = vunpack.c.l.bf16 %v2645_v46 }
  0x5d   :  { %v3212_v40 = vunpack.c.h.bf16 %v2576_v51  ;;  %181 = vst [vmem:[#allocation2 + $0x18] sm:$0xf] %v2268_v16 }
  0x5e   :  { %397 = vadd.xlane.f32.xlu2 %v396_v30  ;;  %v3209_v30 = vunpack.c.l.bf16 %v2576_v51  ;;  %182 = vst [vmem:[#allocation2 + $0x8] sm:$0xf] %v2268_v16 }
  0x5f   :  { %v389_v37 = vsel %vm299_vm0, %v3212_v40, 0.0  ;;  %184 = vst [vmem:[#allocation3 + $0x8] sm:$0xf] %v2268_v16  ;;  %v2619_v40 = vld [vmem:[#allocation4 + $0xa8] sm:$0xff] }
  0x60   :  { %v388_v15 = vsel %vm299_vm0, %v3209_v30, 0.0  ;;  %v3217_v30 = vunpack.c.l.bf16 %v2606_v59  ;;  %v3224_v50 = vunpack.c.l.bf16 %v2619_v40 }
  0x61   :  { %v390_v63 = vadd.f32 %v389_v37, %v388_v15  ;;  %v3221_v37 = vunpack.c.l.bf16 %v2612_v45  ;;  %v3220_v15 = vunpack.c.h.bf16 %v2612_v45 }
  0x62   :  { %v366_v19 = vsel %vm299_vm0, %v3217_v30, 0.0 }
  0x64   :  { %361 = vadd.xlane.f32.xlu1 %v360_v52  ;;  %358 = vadd.xlane.f32.xlu0 %v357_v12  ;;  %v3215_v52 = vunpack.c.l.bf16 %v2590_v61  ;;  %v3214_v12 = vunpack.c.h.bf16 %v2590_v61 }
  0x66   :  { %364 = vadd.xlane.f32.xlu2 %v363_v62  ;;  %v404_v62 = vadd.f32 %v3214_v12, %v3215_v52  ;;  %v3223_v12 = vunpack.c.h.bf16 %v2619_v40  ;;  %v2631_v52 = vld [vmem:[#allocation4 + $0x100] sm:$0x33] }
  0x67   :  { %v3226_v49 = vunpack.c.l.bf16 %v2631_v52  ;;  %v3228_v30 = vunpack.c.h.bf16 %v2631_v52 }
  0x6c   :  { %402 = vadd.xlane.f32.xlu1 %v401_v58  ;;  %391 = vadd.xlane.f32.xlu0 %v390_v63  ;;  %v368_v63 = vadd.f32 %v367_v25, %v366_v19  ;;  %v407_v58 = vadd.f32 %v3220_v15, %v3221_v37  ;;  %v3230_v19 = vunpack.c.l.bf16 %v2639_v48  ;;  %v3229_v25 = vunpack.c.h.bf16 %v2639_v48 }
  0x6d   :  { %v410_v15 = vsel %vm299_vm0, %v3226_v49, 0.0  ;;  %v411_v37 = vsel %vm299_vm0, %v3228_v30, 0.0  ;;  %v2667_v30 = vld [vmem:[#allocation4 + $0x110] sm:$0xff] }
  0x6e   :  { %405 = vadd.xlane.f32.xlu2 %v404_v62  ;;  %v371_v62 = vadd.f32 %v3223_v12, %v3224_v50  ;;  %v3233_v12 = vunpack.c.h.bf16 %v2645_v46  ;;  %v2657_v50 = vld [vmem:[#allocation4 + $0xb8] sm:$0x33] }
  0x6f   :  { %v3235_v49 = vunpack.c.l.bf16 %v2657_v50  ;;  %v3236_v31 = vunpack.c.h.bf16 %v2657_v50 }
  0x71   :  { %v377_v36 = vsel %vm299_vm0, %v3235_v49, 0.0  ;;  %v378_v35 = vsel %vm299_vm0, %v3236_v31, 0.0 }
  0x74   :  { %369 = vadd.xlane.f32.xlu1 %v368_v63  ;;  %408 = vadd.xlane.f32.xlu0 %v407_v58  ;;  %v412_v63 = vadd.f32 %v411_v37, %v410_v15  ;;  %v374_v58 = vadd.f32 %v3229_v25, %v3230_v19  ;;  %v3238_v37 = vunpack.c.l.bf16 %v2663_v32  ;;  %v3239_v15 = vunpack.c.h.bf16 %v2663_v32 }
  0x75   :  { %v3241_v25 = vunpack.c.l.bf16 %v2667_v30  ;;  %v3240_v19 = vunpack.c.h.bf16 %v2667_v30 }
  0x76   :  { %372 = vadd.xlane.f32.xlu2 %v371_v62  ;;  %v415_v62 = vadd.f32 %v3233_v12, %v3234_v47  ;;  %v421_v12 = vsel %vm299_vm0, %v3238_v37, 0.0 }
  0x77   :  { %v418_v47 = vadd.f32 %v3240_v19, %v3241_v25 }
  0x7c   :  { %413 = vadd.xlane.f32.xlu1 %v412_v63  ;;  %375 = vadd.xlane.f32.xlu0 %v374_v58  ;;  %v422_v63 = vsel %vm299_vm0, %v3239_v15, 0.0  ;;  %v379_v58 = vadd.f32 %v378_v35, %v377_v36 }
  0x7d   :  { %v423_v49 = vadd.f32 %v422_v63, %v421_v12 }
  0x7e   :  { %416 = vadd.xlane.f32.xlu2 %v415_v62 }
  0x84   :  { %380 = vadd.xlane.f32.xlu1 %v379_v58  ;;  %419 = vadd.xlane.f32.xlu0 %v418_v47 }
  0x86   :  { %424 = vadd.xlane.f32.xlu2 %v423_v49 }
  0x9f   :  { %v307_v31 = vpop.xlane.xlu1 %306  ;;  %v295_v62 = vpop.xlane.xlu0 %294 }
  0xa0   :  { %vm429_vm2 = vcmp.ne.f32.partialorder %v307_v31, 0.0  ;;  %vm426_vm3 = vcmp.ne.f32.partialorder %v295_v62, 0.0 }
  0xa1   :  { %v304_v34 = vpop.xlane.xlu2 %303  ;;  %v544_v12 = vsel %vm429_vm2, %v227_v3, 0.0  ;;  %v545_v47 = vsel %vm429_vm2, %v228_v4, 0.0  ;;  %v1722_v49 = vsel %vm429_vm2, 1.0, %v2268_v16  ;;  %v538_v31 = vsel %vm426_vm3, %v221_v5, 0.0 }
  0xa2   :  { %vm428_vm1 = vcmp.ne.f32.partialorder %v304_v34, 0.0  ;;  %v539_v34 = vsel %vm426_vm3, %v222_v6, 0.0 }
  0xa3   :  { %v542_v37 = vsel %vm428_vm1, %v225_v9, 0.0  ;;  %v543_v35 = vsel %vm428_vm1, %v226_v10, 0.0  ;;  %v1721_v36 = vsel %vm428_vm1, 1.0, %v2268_v16  ;;  %v1719_v9 = vsel %vm426_vm3, 1.0, %v2268_v16 }
  0xa4   :  { %v611_v2 = vsel %vm299_vm0, %v542_v37, 0.0  ;;  %v620_v58 = vsel %vm299_vm0, %v543_v35, 0.0  ;;  %v928_v3 = vsel %vm299_vm0, %v1721_v36, 0.0 }
  0xa7   :  { %v310_v10 = vpop.xlane.xlu1 %309  ;;  %v298_v63 = vpop.xlane.xlu0 %297 }
  0xa8   :  { %vm430_vm4 = vcmp.ne.f32.partialorder %v310_v10, 0.0  ;;  %vm427_vm5 = vcmp.ne.f32.partialorder %v298_v63, 0.0 }
  0xa9   :  { %v546_v0 = vsel %vm430_vm4, %v229_v14, 0.0  ;;  %v547_v4 = vsel %vm430_vm4, %v230_v17, 0.0  ;;  %v1723_v1 = vsel %vm430_vm4, 1.0, %v2268_v16  ;;  %v540_v5 = vsel %vm427_vm5, %v223_v20, 0.0  ;;  %v315_v6 = vpop.xlane.xlu2 %314 }
  0xaa   :  { %v628_v37 = vadd.f32 %v546_v0, %v544_v12  ;;  %v637_v62 = vadd.f32 %v547_v4, %v545_v47  ;;  %v936_v15 = vadd.f32 %v1723_v1, %v1722_v49  ;;  %v541_v35 = vsel %vm427_vm5, %v224_v21, 0.0 }
  0xab   :  { %v610_v36 = vadd.f32 %v540_v5, %v538_v31  ;;  %v619_v10 = vadd.f32 %v541_v35, %v539_v34  ;;  %v1720_v63 = vsel %vm427_vm5, 1.0, %v2268_v16  ;;  %vm431_vm6 = vcmp.ne.f32.partialorder %v315_v6, 0.0 }
  0xac   :  { %v927_v14 = vadd.f32 %v1720_v63, %v1719_v9  ;;  %v548_v7 = vsel %vm431_vm6, %v231_v18, 0.0  ;;  %v549_v17 = vsel %vm431_vm6, %v232_v22, 0.0  ;;  %v1724_v20 = vsel %vm431_vm6, 1.0, %v2268_v16 }
  0xad   :  { %v612_v12 = vadd.f32 %v611_v2, %v610_v36  ;;  %v621_v47 = vadd.f32 %v620_v58, %v619_v10  ;;  %v629_v49 = vsel %vm299_vm0, %v548_v7, 0.0  ;;  %v638_v11 = vsel %vm299_vm0, %v549_v17, 0.0 }
  0xae   :  { %v929_v21 = vadd.f32 %v928_v3, %v927_v14  ;;  %v630_v31 = vadd.f32 %v629_v49, %v628_v37  ;;  %v639_v34 = vadd.f32 %v638_v11, %v637_v62  ;;  %v937_v0 = vsel %vm299_vm0, %v1724_v20, 0.0 }
  0xaf   :  { %v613_v9 = vrot.slane %v612_v12, 4  ;;  %v622_v4 = vrot.slane %v621_v47, 4  ;;  %v938_v1 = vadd.f32 %v937_v0, %v936_v15  ;;  %v321_v18 = vpop.xlane.xlu1 %320  ;;  %v318_v5 = vpop.xlane.xlu0 %317  ;;  %v3242_v10 = vunpack.c.h.bf16 %v2432_v28 }
  0xb0   :  { %v930_v8 = vrot.slane %v929_v21, 4  ;;  %v631_v22 = vrot.slane %v630_v31, 4  ;;  %v640_v6 = vrot.slane %v639_v34, 4  ;;  %vm433_vm7 = vcmp.ne.f32.partialorder %v321_v18, 0.0 }
  0xb1   :  { %v614_v2 = vadd.f32 %v613_v9, %v612_v12  ;;  %v623_v58 = vadd.f32 %v622_v4, %v621_v47  ;;  %v939_v35 = vrot.slane %v938_v1, 4  ;;  %v552_v3 = vsel %vm433_vm7, %v235_v33, 0.0  ;;  %v326_v47 = vpop.xlane.xlu2 %325 }
  0xb2   :  { %v931_v37 = vadd.f32 %v930_v8, %v929_v21  ;;  %v632_v62 = vadd.f32 %v631_v22, %v630_v31  ;;  %v641_v36 = vadd.f32 %v640_v6, %v639_v34  ;;  %v553_v63 = vsel %vm433_vm7, %v3242_v10, 0.0 }
  0xb3   :  { %v615_v15 = vrot.slane %v614_v2, 2  ;;  %v624_v14 = vrot.slane %v623_v58, 2  ;;  %v940_v7 = vadd.f32 %v939_v35, %v938_v1  ;;  %v1726_v17 = vsel %vm433_vm7, 1.0, %v2268_v16 }
  0xb4   :  { %v932_v20 = vrot.slane %v931_v37, 2  ;;  %v633_v49 = vrot.slane %v632_v62, 2  ;;  %v642_v12 = vrot.slane %v641_v36, 2  ;;  %vm432_vm9 = vcmp.ne.f32.partialorder %v318_v5, 0.0 }
  0xb5   :  { %v616_v11 = vadd.f32 %v615_v15, %v614_v2  ;;  %v625_v0 = vadd.f32 %v624_v14, %v623_v58  ;;  %v941_v9 = vrot.slane %v940_v7, 2  ;;  %v3243_v33 = vunpack.c.l.bf16 %v2434_v29 }
  0xb6   :  { %v933_v31 = vadd.f32 %v932_v20, %v931_v37  ;;  %v634_v28 = vadd.f32 %v633_v49, %v632_v62  ;;  %v643_v34 = vadd.f32 %v642_v12, %v641_v36  ;;  %v3244_v4 = vunpack.c.h.bf16 %v2434_v29 }
  0xb7   :  { %v550_v21 = vsel %vm432_vm9, %v3243_v33, 0.0  ;;  %v617_v18 = vrot.slane %v616_v11, 1  ;;  %v626_v8 = vrot.slane %v625_v0, 1  ;;  %v942_v22 = vadd.f32 %v941_v9, %v940_v7  ;;  %v332_v35 = vpop.xlane.xlu1 %331  ;;  %v329_v10 = vpop.xlane.xlu0 %328 }
  0xb8   :  { %v551_v1 = vsel %vm432_vm9, %v3244_v4, 0.0  ;;  %v646_v6 = vadd.f32 %v552_v3, %v550_v21  ;;  %v934_v2 = vrot.slane %v933_v31, 1  ;;  %v635_v58 = vrot.slane %v634_v28, 1 }
  0xb9   :  { %v644_v15 = vrot.slane %v643_v34, 1  ;;  %v655_v14 = vadd.f32 %v553_v63, %v551_v1  ;;  %v618_v19 = vadd.f32 %v617_v18, %v616_v11  ;;  %v627_v25 = vadd.f32 %v626_v8, %v625_v0 }
  0xba   :  { %v943_v33 = vrot.slane %v942_v22, 1  ;;  %v1725_v37 = vsel %vm432_vm9, 1.0, %v2268_v16  ;;  %v935_v62 = vadd.f32 %v934_v2, %v933_v31  ;;  %v636_v29 = vadd.f32 %v635_v58, %v634_v28 }
  0xbb   :  { %v645_v36 = vadd.f32 %v644_v15, %v643_v34  ;;  %v945_v20 = vadd.f32 %v1726_v17, %v1725_v37  ;;  %vm434_vm10 = vcmp.ne.f32.partialorder %v326_v47, 0.0  ;;  %vm436_vm11 = vcmp.ne.f32.partialorder %v332_v35, 0.0  ;;  %v337_v34 = vpop.xlane.xlu2 %336 }
  0xbc   :  { %v944_v49 = vadd.f32 %v943_v33, %v942_v22  ;;  %vm435_vm12 = vcmp.ne.f32.partialorder %v329_v10, 0.0  ;;  %v2743_v3 = vsel %vm850_vm8, %v636_v29, %v618_v19  ;;  %v3245_v63 = vunpack.c.l.bf16 %v2430_v27 }
  0xbd   :  { %v2746_v7 = vsel %vm850_vm8, %v645_v36, %v627_v25  ;;  %v3246_v5 = vunpack.c.h.bf16 %v2430_v27  ;;  %v1727_v9 = vsel %vm434_vm10, 1.0, %v2268_v16  ;;  %v3247_v31 = vunpack.c.l.bf16 %v2458_v42 }
  0xbe   :  { %v554_v12 = vsel %vm434_vm10, %v3245_v63, 0.0  ;;  %v2753_v0 = vsel %vm850_vm8, %v944_v49, %v935_v62  ;;  %v946_v25 = vsel %vm299_vm0, %v1727_v9, 0.0  ;;  %v3248_v4 = vunpack.c.h.bf16 %v2458_v42 }
  0xbf   :  { %v555_v11 = vsel %vm434_vm10, %v3246_v5, 0.0  ;;  %v647_v17 = vsel %vm299_vm0, %v554_v12, 0.0  ;;  %v558_v28 = vsel %vm436_vm11, %v3247_v31, 0.0  ;;  %v947_v27 = vadd.f32 %v946_v25, %v945_v20  ;;  %v340_v2 = vpop.xlane.xlu0 %339 }
  0xc0   :  { %v656_v47 = vsel %vm299_vm0, %v555_v11, 0.0  ;;  %v648_v19 = vadd.f32 %v647_v17, %v646_v6  ;;  %v559_v1 = vsel %vm436_vm11, %v3248_v4, 0.0  ;;  %v1729_v18 = vsel %vm436_vm11, 1.0, %v2268_v16  ;;  %v343_v6 = vpop.xlane.xlu1 %342 }
  0xc1   :  { %v657_v21 = vadd.f32 %v656_v47, %v655_v14  ;;  %v3249_v8 = vunpack.c.l.bf16 %v2460_v43  ;;  %v3250_v14 = vunpack.c.h.bf16 %v2460_v43  ;;  %v948_v62 = vrot.slane %v947_v27, 4 }
  0xc2   :  { %v649_v58 = vrot.slane %v648_v19, 4  ;;  %v1728_v29 = vsel %vm435_vm12, 1.0, %v2268_v16  ;;  %vm437_vm13 = vcmp.ne.f32.partialorder %v337_v34, 0.0  ;;  %v3251_v49 = vunpack.c.l.bf16 %v2456_v41 }
  0xc3   :  { %v556_v22 = vsel %vm435_vm12, %v3249_v8, 0.0  ;;  %v658_v15 = vrot.slane %v657_v21, 4  ;;  %v557_v33 = vsel %vm435_vm12, %v3250_v14, 0.0  ;;  %v954_v20 = vadd.f32 %v1729_v18, %v1728_v29 }
  0xc4   :  { %v664_v37 = vadd.f32 %v558_v28, %v556_v22  ;;  %v673_v42 = vadd.f32 %v559_v1, %v557_v33  ;;  %v650_v35 = vadd.f32 %v649_v58, %v648_v19  ;;  %v560_v63 = vsel %vm437_vm13, %v3251_v49, 0.0 }
  0xc5   :  { %v659_v36 = vadd.f32 %v658_v15, %v657_v21  ;;  %v949_v12 = vadd.f32 %v948_v62, %v947_v27  ;;  %v3252_v5 = vunpack.c.h.bf16 %v2456_v41  ;;  %v665_v43 = vsel %vm299_vm0, %v560_v63, 0.0  ;;  %v348_v62 = vpop.xlane.xlu2 %347 }
  0xc6   :  { %v1730_v17 = vsel %vm437_vm13, 1.0, %v2268_v16  ;;  %v651_v47 = vrot.slane %v650_v35, 2  ;;  %v666_v25 = vadd.f32 %v665_v43, %v664_v37  ;;  %vm439_vm14 = vcmp.ne.f32.partialorder %v343_v6, 0.0 }
  0xc7   :  { %v561_v11 = vsel %vm437_vm13, %v3252_v5, 0.0  ;;  %v660_v9 = vrot.slane %v659_v36, 2  ;;  %v950_v31 = vrot.slane %v949_v12, 2  ;;  %v955_v21 = vsel %vm299_vm0, %v1730_v17, 0.0  ;;  %v2788_v58 = vpop.xlane.xlu0 %350 }
  0xc8   :  { %v674_v10 = vsel %vm299_vm0, %v561_v11, 0.0  ;;  %v652_v28 = vadd.f32 %v651_v47, %v650_v35  ;;  %v667_v27 = vrot.slane %v666_v25, 4  ;;  %v956_v4 = vadd.f32 %v955_v21, %v954_v20  ;;  %v2786_v22 = vpop.xlane.xlu1 %353 }
  0xc9   :  { %v675_v19 = vadd.f32 %v674_v10, %v673_v42  ;;  %v661_v34 = vadd.f32 %v660_v9, %v659_v36  ;;  %v951_v41 = vadd.f32 %v950_v31, %v949_v12  ;;  %v3253_v18 = vunpack.c.l.bf16 %v2484_v56 }
  0xca   :  { %v653_v15 = vrot.slane %v652_v28, 1  ;;  %v668_v33 = vadd.f32 %v667_v27, %v666_v25  ;;  %v957_v37 = vrot.slane %v956_v4, 4  ;;  %v3254_v35 = vunpack.c.h.bf16 %v2484_v56 }
  0xcb   :  { %v676_v1 = vrot.slane %v675_v19, 4  ;;  %v564_v8 = vsel %vm439_vm14, %v3253_v18, 0.0  ;;  %v662_v14 = vrot.slane %v661_v34, 1  ;;  %v952_v42 = vrot.slane %v951_v41, 1 }
  0xcc   :  { %v565_v36 = vsel %vm439_vm14, %v3254_v35, 0.0  ;;  %vm438_vm1 = vcmp.ne.f32.partialorder %v340_v2, 0.0  ;;  %v654_v20 = vadd.f32 %v653_v15, %v652_v28  ;;  %v669_v63 = vrot.slane %v668_v33, 2 }
  0xcd   :  { %v677_v29 = vadd.f32 %v676_v1, %v675_v19  ;;  %v663_v49 = vadd.f32 %v662_v14, %v661_v34  ;;  %v958_v12 = vadd.f32 %v957_v37, %v956_v4  ;;  %v953_v5 = vadd.f32 %v952_v42, %v951_v41  ;;  %v384_v37 = vpop.xlane.xlu2 %383 }
  0xce   :  { %v3255_v43 = vunpack.c.l.bf16 %v2486_v57  ;;  %v3256_v47 = vunpack.c.h.bf16 %v2486_v57  ;;  %v853_v56 = vsel %vm852_vm15, %v654_v20, %v2743_v3  ;;  %v1732_v19 = vsel %vm439_vm14, 1.0, %v2268_v16 }
  0xcf   :  { %v678_v11 = vrot.slane %v677_v29, 2  ;;  %v865_v25 = vsel %vm852_vm15, %v663_v49, %v2746_v7  ;;  %v1048_v10 = vsel %vm852_vm15, %v953_v5, %v2753_v0  ;;  %v959_v31 = vrot.slane %v958_v12, 2  ;;  %v2809_v3 = vpop.xlane.xlu0 %386 }
  0xd0   :  { %v562_v17 = vsel %vm438_vm1, %v3255_v43, 0.0  ;;  %v563_v9 = vsel %vm438_vm1, %v3256_v47, 0.0  ;;  %v1731_v57 = vsel %vm438_vm1, 1.0, %v2268_v16  ;;  %v670_v34 = vadd.f32 %v669_v63, %v668_v33  ;;  %v395_v4 = vpop.xlane.xlu1 %394 }
  0xd1   :  { %v682_v21 = vadd.f32 %v564_v8, %v562_v17  ;;  %v691_v28 = vadd.f32 %v565_v36, %v563_v9  ;;  %v679_v27 = vadd.f32 %v678_v11, %v677_v29  ;;  %vm440_vm2 = vcmp.ne.f32.partialorder %v348_v62, 0.0 }
  0xd2   :  { %v963_v41 = vadd.f32 %v1732_v19, %v1731_v57  ;;  %v3257_v7 = vunpack.c.l.bf16 %v2482_v55  ;;  %v3258_v0 = vunpack.c.h.bf16 %v2482_v55  ;;  %v960_v6 = vadd.f32 %v959_v31, %v958_v12 }
  0xd3   :  { %v1733_v2 = vsel %vm440_vm2, 1.0, %v2268_v16  ;;  %v671_v62 = vrot.slane %v670_v34, 1  ;;  %v680_v42 = vrot.slane %v679_v27, 1  ;;  %vm442_vm3 = vcmp.ne.f32.partialorder %v2786_v22, 0.0 }
  0xd4   :  { %v566_v1 = vsel %vm440_vm2, %v3257_v7, 0.0  ;;  %v567_v18 = vsel %vm440_vm2, %v3258_v0, 0.0  ;;  %v964_v29 = vsel %vm299_vm0, %v1733_v2, 0.0  ;;  %v961_v49 = vrot.slane %v960_v6, 1 }
  0xd5   :  { %v683_v8 = vsel %vm299_vm0, %v566_v1, 0.0  ;;  %v692_v15 = vsel %vm299_vm0, %v567_v18, 0.0  ;;  %v965_v20 = vadd.f32 %v964_v29, %v963_v41  ;;  %v672_v5 = vadd.f32 %v671_v62, %v670_v34 }
  0xd6   :  { %v684_v14 = vadd.f32 %v683_v8, %v682_v21  ;;  %v693_v33 = vadd.f32 %v692_v15, %v691_v28  ;;  %v681_v11 = vadd.f32 %v680_v42, %v679_v27  ;;  %vm441_vm4 = vcmp.ne.f32.partialorder %v2788_v58, 0.0  ;;  %v398_v15 = vpop.xlane.xlu2 %397 }
  0xd7   :  { %v966_v12 = vrot.slane %v965_v20, 4  ;;  %vm854_vm5 = vcmask 1043459   ;;  %v962_v47 = vadd.f32 %v961_v49, %v960_v6  ;;  %v359_v19 = vpop.xlane.xlu0 %358  ;;  %v3259_v57 = vunpack.c.l.bf16 %v2508_v23 }
  0xd8   :  { %v685_v35 = vrot.slane %v684_v14, 4  ;;  %v694_v36 = vrot.slane %v693_v33, 4  ;;  %v2821_v31 = vpop.xlane.xlu1 %361  ;;  %v3260_v27 = vunpack.c.l.bf16 %v2510_v24  ;;  %v2832_v7 = vsel %vm854_vm5, %v672_v5, %v853_v56 }
  0xd9   :  { %v967_v17 = vadd.f32 %v966_v12, %v965_v20  ;;  %v570_v34 = vsel %vm442_vm3, %v3259_v57, 0.0  ;;  %v2835_v1 = vsel %vm854_vm5, %v681_v11, %v865_v25  ;;  %vm450_vm6 = vcmp.ne.f32.partialorder %v384_v37, 0.0 }
  0xda   :  { %v686_v55 = vadd.f32 %v685_v35, %v684_v14  ;;  %v695_v63 = vadd.f32 %v694_v36, %v693_v33  ;;  %v568_v41 = vsel %vm441_vm4, %v3260_v27, 0.0  ;;  %vm451_vm7 = vcmp.ne.f32.partialorder %v2809_v3, 0.0 }
  0xdb   :  { %v968_v28 = vrot.slane %v967_v17, 2  ;;  %v3261_v0 = vunpack.c.h.bf16 %v2508_v23  ;;  %v1735_v6 = vsel %vm442_vm3, 1.0, %v2268_v16  ;;  %v3262_v8 = vunpack.c.h.bf16 %v2510_v24 }
  0xdc   :  { %v687_v43 = vrot.slane %v686_v55, 2  ;;  %v696_v9 = vrot.slane %v695_v63, 2  ;;  %v1734_v25 = vsel %vm441_vm4, 1.0, %v2268_v16  ;;  %v2853_v2 = vsel %vm854_vm5, %v962_v47, %v1048_v10 }
  0xdd   :  { %v571_v18 = vsel %vm442_vm3, %v3261_v0, 0.0  ;;  %v569_v56 = vsel %vm441_vm4, %v3262_v8, 0.0  ;;  %v700_v14 = vadd.f32 %v570_v34, %v568_v41  ;;  %vm453_vm9 = vcmp.ne.f32.partialorder %v395_v4, 0.0 }
  0xde   :  { %v688_v21 = vadd.f32 %v687_v43, %v686_v55  ;;  %v2855_v23 = vadd.f32 %v696_v9, %v695_v63  ;;  %v2857_v22 = vadd.f32 %v968_v28, %v967_v17  ;;  %v3263_v24 = vunpack.c.l.bf16 %v2512_v26 }
  0xdf   :  { %v3264_v42 = vunpack.c.l.bf16 %v2530_v54  ;;  %v709_v29 = vadd.f32 %v571_v18, %v569_v56  ;;  %v972_v35 = vadd.f32 %v1735_v6, %v1734_v25  ;;  %v3265_v10 = vunpack.c.h.bf16 %v2512_v26  ;;  %v2898_v0 = vpop.xlane.xlu0 %391 }
  0xe0   :  { %v689_v33 = vrot.slane %v688_v21, 1  ;;  %v586_v62 = vsel %vm450_vm6, %v3263_v24, 0.0  ;;  %vm454_vm10 = vcmp.ne.f32.partialorder %v398_v15, 0.0  ;;  %v2871_v4 = vsel %vm450_vm6, 1.0, %v2268_v16 }
  0xe1   :  { %v588_v58 = vsel %vm451_vm7, %v3264_v42, 0.0  ;;  %v587_v36 = vsel %vm450_vm6, %v3265_v10, 0.0  ;;  %v3266_v20 = vunpack.c.l.bf16 %v2528_v53  ;;  %v3267_v55 = vunpack.c.h.bf16 %v2528_v53  ;;  %v365_v10 = vpop.xlane.xlu2 %364 }
  0xe2   :  { %v1746_v12 = vsel %vm453_vm9, 1.0, %v2268_v16  ;;  %v698_v5 = vrot.slane %v2855_v23, 1  ;;  %v3268_v11 = vunpack.c.h.bf16 %v2530_v54  ;;  %v754_v43 = vadd.f32 %v588_v58, %v586_v62 }
  0xe3   :  { %v592_v49 = vsel %vm453_vm9, %v3266_v20, 0.0  ;;  %v593_v63 = vsel %vm453_vm9, %v3267_v55, 0.0  ;;  %v1744_v37 = vsel %vm451_vm7, 1.0, %v2268_v16  ;;  %v690_v17 = vadd.f32 %v689_v33, %v688_v21  ;;  %v403_v21 = vpop.xlane.xlu1 %402 }
  0xe4   :  { %v589_v26 = vsel %vm451_vm7, %v3268_v11, 0.0  ;;  %v970_v47 = vrot.slane %v2857_v22, 1  ;;  %v3269_v53 = vunpack.c.l.bf16 %v2536_v13  ;;  %vm443_vm11 = vcmp.ne.f32.partialorder %v359_v19, 0.0 }
  0xe5   :  { %v3270_v28 = vunpack.c.h.bf16 %v2536_v13  ;;  %v3271_v57 = vunpack.c.l.bf16 %v2544_v38  ;;  %v3272_v27 = vunpack.c.h.bf16 %v2544_v38  ;;  %v1736_v3 = vsel %vm443_vm11, 1.0, %v2268_v16 }
  0xe6   :  { %v594_v9 = vsel %vm454_vm10, %v3269_v53, 0.0  ;;  %vm856_vm12 = vcmask 1044484   ;;  %v1747_v18 = vsel %vm454_vm10, 1.0, %v2268_v16  ;;  %v973_v6 = vsel %vm299_vm0, %v1736_v3, 0.0 }
  0xe7   :  { %v595_v54 = vsel %vm454_vm10, %v3270_v28, 0.0  ;;  %v572_v34 = vsel %vm443_vm11, %v3271_v57, 0.0  ;;  %v573_v41 = vsel %vm443_vm11, %v3272_v27, 0.0  ;;  %v763_v8 = vadd.f32 %v589_v26, %v587_v36 }
  0xe8   :  { %v701_v19 = vsel %vm299_vm0, %v572_v34, 0.0  ;;  %v710_v13 = vsel %vm299_vm0, %v573_v41, 0.0  ;;  %v974_v38 = vadd.f32 %v973_v6, %v972_v35  ;;  %v772_v33 = vadd.f32 %v594_v9, %v592_v49 }
  0xe9   :  { %v702_v56 = vadd.f32 %v701_v19, %v700_v14  ;;  %v711_v25 = vadd.f32 %v710_v13, %v709_v29  ;;  %v781_v24 = vadd.f32 %v595_v54, %v593_v63  ;;  %vm455_vm13 = vcmp.ne.f32.partialorder %v403_v21, 0.0 }
  0xea   :  { %vm452_vm14 = vcmp.ne.f32.partialorder %v2898_v0, 0.0  ;;  %v1008_v62 = vadd.f32 %v1747_v18, %v1746_v12  ;;  %vm444_vm1 = vcmp.ne.f32.partialorder %v2821_v31, 0.0  ;;  %v975_v58 = vrot.slane %v974_v38, 4 }
  0xeb   :  { %v703_v15 = vrot.slane %v702_v56, 4  ;;  %v712_v42 = vrot.slane %v711_v25, 4  ;;  %v3273_v20 = vunpack.c.l.bf16 %v2574_v39  ;;  %v3274_v36 = vunpack.c.h.bf16 %v2574_v39 }
  0xec   :  { %v1748_v29 = vsel %vm455_vm13, 1.0, %v2268_v16  ;;  %v3275_v35 = vunpack.c.l.bf16 %v2576_v51  ;;  %v976_v11 = vadd.f32 %v975_v58, %v974_v38  ;;  %v3276_v39 = vunpack.c.h.bf16 %v2576_v51 }
  0xed   :  { %v596_v55 = vsel %vm455_vm13, %v3273_v20, 0.0  ;;  %v597_v14 = vsel %vm455_vm13, %v3274_v36, 0.0  ;;  %v704_v63 = vadd.f32 %v703_v15, %v702_v56  ;;  %v713_v12 = vadd.f32 %v712_v42, %v711_v25 }
  0xee   :  { %v590_v49 = vsel %vm452_vm14, %v3275_v35, 0.0  ;;  %v773_v26 = vsel %vm299_vm0, %v596_v55, 0.0  ;;  %v782_v9 = vsel %vm299_vm0, %v597_v14, 0.0  ;;  %v1009_v28 = vsel %vm299_vm0, %v1748_v29, 0.0 }
  0xef   :  { %v774_v53 = vadd.f32 %v773_v26, %v772_v33  ;;  %v591_v54 = vsel %vm452_vm14, %v3276_v39, 0.0  ;;  %v705_v57 = vrot.slane %v704_v63, 2  ;;  %v714_v34 = vrot.slane %v713_v12, 2 }
  0xf0   :  { %v977_v27 = vrot.slane %v976_v11, 2  ;;  %v783_v41 = vadd.f32 %v782_v9, %v781_v24  ;;  %v1010_v21 = vadd.f32 %v1009_v28, %v1008_v62  ;;  %v755_v18 = vsel %vm299_vm0, %v590_v49, 0.0  ;;  %v370_v9 = vpop.xlane.xlu1 %369 }
  0xf1   :  { %v775_v3 = vrot.slane %v774_v53, 4  ;;  %v764_v19 = vsel %vm299_vm0, %v591_v54, 0.0  ;;  %v706_v13 = vadd.f32 %v705_v57, %v704_v63  ;;  %v715_v6 = vadd.f32 %v714_v34, %v713_v12 }
  0xf2   :  { %v978_v56 = vadd.f32 %v977_v27, %v976_v11  ;;  %v784_v25 = vrot.slane %v783_v41, 4  ;;  %v1011_v33 = vrot.slane %v1010_v21, 4  ;;  %v756_v51 = vadd.f32 %v755_v18, %v754_v43  ;;  %v409_v18 = vpop.xlane.xlu0 %408 }
  0xf3   :  { %v776_v38 = vadd.f32 %v775_v3, %v774_v53  ;;  %v765_v15 = vadd.f32 %v764_v19, %v763_v8  ;;  %v699_v42 = vadd.f32 %v698_v5, %v2855_v23  ;;  %v857_v58 = vsel %vm856_vm12, %v690_v17, %v2832_v7  ;;  %v2940_v17 = vpop.xlane.xlu2 %405 }
  0xf4   :  { %v999_v24 = vadd.f32 %v1744_v37, %v2871_v4  ;;  %v785_v62 = vadd.f32 %v784_v25, %v783_v41  ;;  %v707_v20 = vrot.slane %v706_v13, 1  ;;  %v716_v55 = vrot.slane %v715_v6, 1 }
  0xf5   :  { %vm445_vm2 = vcmp.ne.f32.partialorder %v365_v10, 0.0  ;;  %v777_v36 = vrot.slane %v776_v38, 2  ;;  %v971_v14 = vadd.f32 %v970_v47, %v2857_v22  ;;  %v979_v29 = vrot.slane %v978_v56, 1 }
  0xf6   :  { %v1012_v35 = vadd.f32 %v1011_v33, %v1010_v21  ;;  %v757_v43 = vrot.slane %v756_v51, 4  ;;  %v3277_v8 = vunpack.c.l.bf16 %v2554_v44  ;;  %v3278_v7 = vunpack.c.h.bf16 %v2554_v44 }
  0xf7   :  { %v786_v5 = vrot.slane %v785_v62, 2  ;;  %v766_v37 = vrot.slane %v765_v15, 4  ;;  %v1737_v22 = vsel %vm444_vm1, 1.0, %v2268_v16  ;;  %vm858_vm3 = vcmask 1045509  }
  0xf8   :  { %v574_v23 = vsel %vm444_vm1, %v3277_v8, 0.0  ;;  %v575_v4 = vsel %vm444_vm1, %v3278_v7, 0.0  ;;  %v3279_v47 = vunpack.c.l.bf16 %v2562_v60  ;;  %v3280_v63 = vunpack.c.h.bf16 %v2562_v60 }
  0xf9   :  { %v708_v12 = vadd.f32 %v707_v20, %v706_v13  ;;  %v717_v11 = vadd.f32 %v716_v55, %v715_v6  ;;  %v1738_v26 = vsel %vm445_vm2, 1.0, %v2268_v16  ;;  %v778_v53 = vadd.f32 %v777_v36, %v776_v38 }
  0xfa   :  { %v576_v49 = vsel %vm445_vm2, %v3279_v47, 0.0  ;;  %v577_v44 = vsel %vm445_vm2, %v3280_v63, 0.0  ;;  %v980_v28 = vadd.f32 %v979_v29, %v978_v56  ;;  %v1013_v39 = vrot.slane %v1012_v35, 2 }
  0xfb   :  { %v758_v31 = vadd.f32 %v757_v43, %v756_v51  ;;  %v1745_v54 = vsel %vm452_vm14, 1.0, %v2268_v16  ;;  %v867_v57 = vsel %vm856_vm12, %v699_v42, %v2835_v1  ;;  %v1050_v60 = vsel %vm856_vm12, %v971_v14, %v2853_v2  ;;  %v2984_v14 = vpop.xlane.xlu2 %372 }
  0xfc   :  { %v2960_v34 = vadd.f32 %v786_v5, %v785_v62  ;;  %v767_v27 = vadd.f32 %v766_v37, %v765_v15  ;;  %v718_v10 = vadd.f32 %v576_v49, %v574_v23  ;;  %v727_v41 = vadd.f32 %v577_v44, %v575_v4  ;;  %v414_v37 = vpop.xlane.xlu1 %413 }
  0xfd   :  { %v981_v3 = vadd.f32 %v1738_v26, %v1737_v22  ;;  %v1000_v21 = vsel %vm299_vm0, %v1745_v54, 0.0  ;;  %v2964_v19 = vsel %vm858_vm3, %v708_v12, %v857_v58  ;;  %v2967_v0 = vsel %vm858_vm3, %v717_v11, %v867_v57  ;;  %v376_v57 = vpop.xlane.xlu0 %375 }
  0xfe   :  { %v779_v13 = vrot.slane %v778_v53, 1  ;;  %v1001_v1 = vadd.f32 %v1000_v21, %v999_v24  ;;  %v2970_v6 = vsel %vm858_vm3, %v980_v28, %v1050_v60  ;;  %v2972_v2 = vadd.f32 %v1013_v39, %v1012_v35 }
  0xff   :  { %v759_v56 = vrot.slane %v758_v31, 2  ;;  %vm446_vm4 = vcmp.ne.f32.partialorder %v370_v9, 0.0  ;;  %v788_v25 = vrot.slane %v2960_v34, 1  ;;  %v768_v38 = vrot.slane %v767_v27, 2 }
 0x100   :  { %v1002_v33 = vrot.slane %v1001_v1, 4  ;;  %v3281_v51 = vunpack.c.l.bf16 %v2606_v59  ;;  %v3282_v42 = vunpack.c.h.bf16 %v2606_v59  ;;  %v1739_v24 = vsel %vm446_vm4, 1.0, %v2268_v16 }
 0x101   :  { %vm457_vm6 = vcmp.ne.f32.partialorder %v409_v18, 0.0  ;;  %v2981_v20 = vadd.f32 %v779_v13, %v778_v53  ;;  %vm456_vm7 = vcmp.ne.f32.partialorder %v2940_v17, 0.0  ;;  %v1015_v29 = vrot.slane %v2972_v2, 1 }
 0x102   :  { %v578_v15 = vsel %vm446_vm4, %v3281_v51, 0.0  ;;  %v579_v58 = vsel %vm446_vm4, %v3282_v42, 0.0  ;;  %v1003_v55 = vadd.f32 %v1002_v33, %v1001_v1  ;;  %v760_v35 = vadd.f32 %v759_v56, %v758_v31 }
 0x103   :  { %v719_v62 = vsel %vm299_vm0, %v578_v15, 0.0  ;;  %v728_v43 = vsel %vm299_vm0, %v579_v58, 0.0  ;;  %v982_v59 = vsel %vm299_vm0, %v1739_v24, 0.0  ;;  %v3283_v4 = vunpack.c.l.bf16 %v2612_v45 }
 0x104   :  { %v720_v36 = vadd.f32 %v719_v62, %v718_v10  ;;  %v729_v23 = vadd.f32 %v728_v43, %v727_v41  ;;  %v983_v7 = vadd.f32 %v982_v59, %v981_v3  ;;  %v769_v22 = vadd.f32 %v768_v38, %v767_v27 }
 0x105   :  { %v600_v5 = vsel %vm457_vm6, %v3283_v4, 0.0  ;;  %v3284_v47 = vunpack.c.l.bf16 %v2590_v61  ;;  %v3285_v63 = vunpack.c.h.bf16 %v2590_v61  ;;  %v3286_v12 = vunpack.c.h.bf16 %v2612_v45 }
 0x106   :  { %v721_v8 = vrot.slane %v720_v36, 4  ;;  %v1004_v26 = vrot.slane %v1003_v55, 2  ;;  %v730_v9 = vrot.slane %v729_v23, 4  ;;  %v984_v28 = vrot.slane %v983_v7, 4 }
 0x107   :  { %v598_v49 = vsel %vm456_vm7, %v3284_v47, 0.0  ;;  %v599_v44 = vsel %vm456_vm7, %v3285_v63, 0.0  ;;  %v601_v11 = vsel %vm457_vm6, %v3286_v12, 0.0  ;;  %v761_v39 = vrot.slane %v760_v35, 1 }
 0x108   :  { %v722_v53 = vadd.f32 %v721_v8, %v720_v36  ;;  %v1749_v31 = vsel %vm456_vm7, 1.0, %v2268_v16  ;;  %v790_v54 = vadd.f32 %v600_v5, %v598_v49  ;;  %vm458_vm9 = vcmp.ne.f32.partialorder %v414_v37, 0.0  ;;  %v417_v36 = vpop.xlane.xlu2 %416 }
 0x109   :  { %v731_v60 = vadd.f32 %v730_v9, %v729_v23  ;;  %v985_v27 = vadd.f32 %v984_v28, %v983_v7  ;;  %v1750_v45 = vsel %vm457_vm6, 1.0, %v2268_v16  ;;  %vm860_vm10 = vcmask 1046534   ;;  %v420_v9 = vpop.xlane.xlu0 %419 }
 0x10a   :  { %v723_v61 = vrot.slane %v722_v53, 2  ;;  %v799_v10 = vadd.f32 %v601_v11, %v599_v44  ;;  %v3287_v41 = vunpack.c.l.bf16 %v2631_v52  ;;  %v3288_v21 = vunpack.c.h.bf16 %v2631_v52 }
 0x10b   :  { %v1751_v17 = vsel %vm458_vm9, 1.0, %v2268_v16  ;;  %v1005_v1 = vadd.f32 %v1004_v26, %v1003_v55  ;;  %v732_v38 = vrot.slane %v731_v60, 2  ;;  %v986_v33 = vrot.slane %v985_v27, 2 }
 0x10c   :  { %v602_v3 = vsel %vm458_vm9, %v3287_v41, 0.0  ;;  %v603_v13 = vsel %vm458_vm9, %v3288_v21, 0.0  ;;  %v724_v56 = vadd.f32 %v723_v61, %v722_v53  ;;  %v1017_v51 = vadd.f32 %v1750_v45, %v1749_v31 }
 0x10d   :  { %v791_v15 = vsel %vm299_vm0, %v602_v3, 0.0  ;;  %v800_v18 = vsel %vm299_vm0, %v603_v13, 0.0  ;;  %v1018_v42 = vsel %vm299_vm0, %v1751_v17, 0.0  ;;  %v770_v58 = vrot.slane %v769_v22, 1 }
 0x10e   :  { %v725_v62 = vrot.slane %v724_v56, 1  ;;  %v733_v24 = vadd.f32 %v732_v38, %v731_v60  ;;  %vm448_vm11 = vcmp.ne.f32.partialorder %v376_v57, 0.0  ;;  %v987_v52 = vadd.f32 %v986_v33, %v985_v27 }
 0x10f   :  { %v792_v43 = vadd.f32 %v791_v15, %v790_v54  ;;  %v801_v59 = vadd.f32 %v800_v18, %v799_v10  ;;  %v1019_v8 = vadd.f32 %v1018_v42, %v1017_v51  ;;  %v3017_v55 = vadd.f32 %v788_v25, %v2960_v34 }
 0x110   :  { %v3020_v23 = vadd.f32 %v1015_v29, %v2972_v2  ;;  %v1006_v7 = vrot.slane %v1005_v1, 1  ;;  %vm447_vm12 = vcmp.ne.f32.partialorder %v2984_v14, 0.0  ;;  %v3023_v4 = vadd.f32 %v761_v39, %v760_v35 }
 0x111   :  { %v793_v5 = vrot.slane %v792_v43, 4  ;;  %v802_v37 = vrot.slane %v801_v59, 4  ;;  %v3289_v47 = vunpack.c.l.bf16 %v2639_v48  ;;  %v3028_v63 = vadd.f32 %v770_v58, %v769_v22  ;;  %v381_v22 = vpop.xlane.xlu1 %380 }
 0x112   :  { %v726_v44 = vadd.f32 %v725_v62, %v724_v56  ;;  %v734_v12 = vrot.slane %v733_v24, 1  ;;  %v3290_v34 = vunpack.c.h.bf16 %v2639_v48  ;;  %v988_v25 = vrot.slane %v987_v52, 1  ;;  %v425_v56 = vpop.xlane.xlu2 %424 }
 0x113   :  { %v582_v49 = vsel %vm448_vm11, %v3289_v47, 0.0  ;;  %v3291_v29 = vunpack.c.l.bf16 %v2619_v40  ;;  %v3292_v11 = vunpack.c.h.bf16 %v2619_v40  ;;  %v1020_v53 = vrot.slane %v1019_v8, 4 }
 0x114   :  { %v583_v2 = vsel %vm448_vm11, %v3290_v34, 0.0  ;;  %v3041_v28 = vadd.f32 %v1006_v7, %v1005_v1  ;;  %v1740_v48 = vsel %vm447_vm12, 1.0, %v2268_v16  ;;  %v1741_v31 = vsel %vm448_vm11, 1.0, %v2268_v16 }
 0x115   :  { %v580_v35 = vsel %vm447_vm12, %v3291_v29, 0.0  ;;  %v581_v26 = vsel %vm447_vm12, %v3292_v11, 0.0  ;;  %v794_v54 = vadd.f32 %v793_v5, %v792_v43  ;;  %v803_v61 = vadd.f32 %v802_v37, %v801_v59  ;;  %v1922_v29 = vld [vmem:[#allocation7 + $0x38] sm:$0xff] }
 0x116   :  { %v736_v39 = vadd.f32 %v582_v49, %v580_v35  ;;  %v745_v60 = vadd.f32 %v583_v2, %v581_v26  ;;  %vm459_vm13 = vcmp.ne.f32.partialorder %v417_v36, 0.0  ;;  %v3048_v40 = vadd.f32 %v734_v12, %v733_v24  ;;  %v1930_v35 = vld [vmem:[#allocation7 + $0x78] sm:$0xff]  ;;  %1250 = vmatpush.bf16.msra.mxu0 %v1922_v29 }
 0x117   :  { %v3052_v27 = vsel %vm860_vm10, %v726_v44, %v2964_v19  ;;  %vm449_vm14 = vcmp.ne.f32.partialorder %v381_v22, 0.0  ;;  %vm460_vm1 = vcmp.ne.f32.partialorder %v420_v9, 0.0  ;;  %v3054_v45 = vadd.f32 %v988_v25, %v987_v52  ;;  %1264 = vmatpush.bf16.msra.mxu1 %v1930_v35 }
 0x118   :  { %v1021_v14 = vadd.f32 %v1020_v53, %v1019_v8  ;;  %v990_v10 = vadd.f32 %v1741_v31, %v1740_v48  ;;  %v3293_v41 = vunpack.c.l.bf16 %v2657_v50  ;;  %v3294_v3 = vunpack.c.l.bf16 %v2645_v46 }
 0x119   :  { %v3295_v13 = vunpack.c.h.bf16 %v2657_v50  ;;  %v1742_v19 = vsel %vm449_vm14, 1.0, %v2268_v16  ;;  %v795_v38 = vrot.slane %v794_v54, 2  ;;  %v804_v33 = vrot.slane %v803_v61, 2 }
 0x11a   :  { %v584_v57 = vsel %vm449_vm14, %v3293_v41, 0.0  ;;  %v604_v21 = vsel %vm459_vm13, %v3294_v3, 0.0  ;;  %v3296_v15 = vunpack.c.l.bf16 %v2667_v30  ;;  %v3297_v42 = vunpack.c.h.bf16 %v2645_v46 }
 0x11b   :  { %v585_v17 = vsel %vm449_vm14, %v3295_v13, 0.0  ;;  %v737_v1 = vsel %vm299_vm0, %v584_v57, 0.0  ;;  %v991_v50 = vsel %vm299_vm0, %v1742_v19, 0.0  ;;  %v3298_v24 = vunpack.c.h.bf16 %v2667_v30 }
 0x11c   :  { %v738_v51 = vadd.f32 %v737_v1, %v736_v39  ;;  %v606_v18 = vsel %vm460_vm1, %v3296_v15, 0.0  ;;  %v605_v58 = vsel %vm459_vm13, %v3297_v42, 0.0  ;;  %v746_v62 = vsel %vm299_vm0, %v585_v17, 0.0  ;;  %v1920_v15 = vld [vmem:[#allocation7 + $0x28] sm:$0xff] }
 0x11d   :  { %v607_v52 = vsel %vm460_vm1, %v3298_v24, 0.0  ;;  %v1022_v43 = vrot.slane %v1021_v14, 2  ;;  %v1752_v59 = vsel %vm459_vm13, 1.0, %v2268_v16  ;;  %vm461_vm2 = vcmp.ne.f32.partialorder %v425_v56, 0.0 }
 0x11e   :  { %v739_v8 = vrot.slane %v738_v51, 4  ;;  %v747_v7 = vadd.f32 %v746_v62, %v745_v60  ;;  %v992_v5 = vadd.f32 %v991_v50, %v990_v10  ;;  %v808_v37 = vadd.f32 %v606_v18, %v604_v21  ;;  %v1929_v60 = vld [vmem:[#allocation7 + $0x70] sm:$0xff]  ;;  %v1928_v50 = vld [vmem:[#allocation7 + $0x68] sm:$0xff] }
 0x11f   :  { %v1753_v46 = vsel %vm460_vm1, 1.0, %v2268_v16  ;;  %v796_v47 = vadd.f32 %v795_v38, %v794_v54  ;;  %v3080_v49 = vadd.f32 %v804_v33, %v803_v61  ;;  %v817_v12 = vadd.f32 %v607_v52, %v605_v58  ;;  %v1921_v61 = vld [vmem:[#allocation7 + $0x30] sm:$0xff]  ;;  %1265 = vmatpush.bf16.msra.mxu1 %v1929_v60 }
 0x120   :  { %v740_v44 = vadd.f32 %v739_v8, %v738_v51  ;;  %v748_v30 = vrot.slane %v747_v7, 4  ;;  %v993_v34 = vrot.slane %v992_v5, 4  ;;  %v1026_v2 = vadd.f32 %v1753_v46, %v1752_v59  ;;  %1251 = vmatpush.bf16.msra.mxu0 %v1921_v61 }
 0x121   :  { %v3299_v25 = vunpack.c.l.bf16 %v2663_v32  ;;  %v3300_v26 = vunpack.c.h.bf16 %v2663_v32  ;;  %v1754_v9 = vsel %vm461_vm2, 1.0, %v2268_v16  ;;  %v2269_v17 = vmov 0  }
 0x122   :  { %v741_v11 = vrot.slane %v740_v44, 2  ;;  %v749_v48 = vadd.f32 %v748_v30, %v747_v7  ;;  %v994_v39 = vadd.f32 %v993_v34, %v992_v5  ;;  %v1027_v32 = vsel %vm299_vm0, %v1754_v9, 0.0  ;;  %1975 = vset.pattern.permute.xlu0 %v2269_v17  ;;  %1976 = vset.pattern.permute.xlu1 %v2269_v17  ;;  %v1916_v17 = vld [vmem:[#allocation7 + $0x8] sm:$0xff] }
 0x123   :  { %v608_v36 = vsel %vm461_vm2, %v3299_v25, 0.0  ;;  %v609_v53 = vsel %vm461_vm2, %v3300_v26, 0.0  ;;  %v1028_v13 = vadd.f32 %v1027_v32, %v1026_v2  ;;  %v1023_v16 = vadd.f32 %v1022_v43, %v1021_v14  ;;  %1266 = vmatpush.bf16.msra.mxu1 %v1928_v50  ;;  %v465_v26 = vld [vmem:[#allocation2 + $0x8] sm:$0xf] }
 0x124   :  { %v809_v22 = vsel %vm299_vm0, %v608_v36, 0.0  ;;  %v818_v54 = vsel %vm299_vm0, %v609_v53, 0.0  ;;  %v742_v10 = vadd.f32 %v741_v11, %v740_v44  ;;  %v750_v57 = vrot.slane %v749_v48, 2  ;;  %1252 = vmatpush.bf16.msra.mxu0 %v1920_v15 }
 0x125   :  { %v810_v31 = vadd.f32 %v809_v22, %v808_v37  ;;  %v819_v41 = vadd.f32 %v818_v54, %v817_v12  ;;  %v995_v3 = vrot.slane %v994_v39, 2  ;;  %vm862_vm3 = vcmask 1047559  }
 0x126   :  { %v743_v1 = vrot.slane %v742_v10, 1  ;;  %v751_v56 = vadd.f32 %v750_v57, %v749_v48  ;;  %v1029_v51 = vrot.slane %v1028_v13, 4  ;;  %v797_v18 = vrot.slane %v796_v47, 1  ;;  %v1919_v57 = vld [vmem:[#allocation7 + $0x20] sm:$0xff] }
 0x127   :  { %v811_v21 = vrot.slane %v810_v31, 4  ;;  %v820_v19 = vrot.slane %v819_v41, 4  ;;  %v996_v38 = vadd.f32 %v995_v3, %v994_v39  ;;  %v806_v42 = vrot.slane %v3080_v49, 1  ;;  %v1926_v3 = vld [vmem:[#allocation7 + $0x58] sm:$0xff] }
 0x128   :  { %v744_v58 = vadd.f32 %v743_v1, %v742_v10  ;;  %v752_v24 = vrot.slane %v751_v56, 1  ;;  %v1030_v14 = vadd.f32 %v1029_v51, %v1028_v13  ;;  %v869_v43 = vsel %vm860_vm10, %v3048_v40, %v2967_v0  ;;  %1253 = vmatpush.bf16.msra.mxu0 %v1919_v57  ;;  %v1925_v13 = vld [vmem:[#allocation7 + $0x50] sm:$0xff]  ;;  %v1915_v1 = vld [vmem:[#allocation7] sm:$0xff] }
 0x129   :  { %v812_v33 = vadd.f32 %v811_v21, %v810_v31  ;;  %v821_v62 = vadd.f32 %v820_v19, %v819_v41  ;;  %v997_v52 = vrot.slane %v996_v38, 1  ;;  %v1024_v8 = vrot.slane %v1023_v16, 1  ;;  %v1917_v21 = vld [vmem:[#allocation7 + $0x10] sm:$0xff]  ;;  %v1923_v19 = vld [vmem:[#allocation7 + $0x40] sm:$0xff] }
 0x12a   :  { %v3099_v7 = vsel %vm862_vm3, %v744_v58, %v3052_v27  ;;  %v753_v37 = vadd.f32 %v752_v24, %v751_v56  ;;  %v1052_v12 = vsel %vm860_vm10, %v3054_v45, %v2970_v6  ;;  %v798_v30 = vadd.f32 %v797_v18, %v796_v47  ;;  %v464_v47 = vld [vmem:[#allocation2 + $0x18] sm:$0xf] }
 0x12b   :  { %v813_v59 = vrot.slane %v812_v33, 2  ;;  %v822_v5 = vrot.slane %v821_v62, 2  ;;  %v998_v46 = vadd.f32 %v997_v52, %v996_v38  ;;  %v1031_v2 = vrot.slane %v1030_v14, 2 }
 0x12c   :  { %v807_v0 = vadd.f32 %v806_v42, %v3080_v49  ;;  %v3106_v40 = vsel %vm862_vm3, %v753_v37, %v869_v43  ;;  %v871_v35 = vsel %vm850_vm8, %v2981_v20, %v3023_v4  ;;  %v874_v6 = vsel %vm850_vm8, %v3017_v55, %v3028_v63  ;;  %v890_v63 = vld [vmem:[#allocation3 + $0x8] sm:$0xf] }
 0x12d   :  { %v814_v44 = vadd.f32 %v813_v59, %v812_v33  ;;  %v823_v34 = vadd.f32 %v822_v5, %v821_v62  ;;  %v1053_v27 = vsel %vm862_vm3, %v998_v46, %v1052_v12  ;;  %v1032_v29 = vadd.f32 %v1031_v2, %v1030_v14 }
 0x12e   :  { %v1025_v45 = vadd.f32 %v1024_v8, %v1023_v16  ;;  %v872_v49 = vsel %vm852_vm15, %v798_v30, %v871_v35  ;;  %v1072_v9 = vadd.f32 1e-10, %v1053_v27  ;;  %v875_v48 = vsel %vm852_vm15, %v807_v0, %v874_v6  ;;  %v1924_v16 = vld [vmem:[#allocation7 + $0x48] sm:$0xff] }
 0x12f   :  { %v815_v25 = vrot.slane %v814_v44, 1  ;;  %v824_v36 = vrot.slane %v823_v34, 1  ;;  %v1033_v22 = vrot.slane %v1032_v29, 1  ;;  %v1054_v20 = vsel %vm850_vm8, %v3020_v23, %v3041_v28  ;;  %v1927_v23 = vld [vmem:[#allocation7 + $0x60] sm:$0xff]  ;;  %v1918_v28 = vld [vmem:[#allocation7 + $0x18] sm:$0xff] }
 0x130   :  { %1076 = vperm.xlu0 %1975, %v1072_v9   ;;  %v1055_v54 = vsel %vm852_vm15, %v1025_v45, %v1054_v20  ;;  %1267 = vmatpush.bf16.msra.mxu1 %v1927_v23 }
 0x131   :  { %v816_v11 = vadd.f32 %v815_v25, %v814_v44  ;;  %v825_v53 = vadd.f32 %v824_v36, %v823_v34  ;;  %v1034_v31 = vadd.f32 %v1033_v22, %v1032_v29  ;;  %1254 = vmatpush.bf16.msra.mxu0 %v1918_v28  ;;  %v1938_v28 = vld [vmem:[#allocation12 + $0x38] sm:$0xff] }
 0x132   :  { %1410 = vmatpush.bf16.msra.mxu2 %v1938_v28 }
 0x133   :  { %v873_v39 = vsel %vm854_vm5, %v816_v11, %v872_v49  ;;  %v876_v4 = vsel %vm854_vm5, %v825_v53, %v875_v48  ;;  %v1056_v60 = vsel %vm854_vm5, %v1034_v31, %v1055_v54  ;;  %v2270_v48 = vmov 128.0  }
 0x134   :  { %v883_v55 = vadd.f32 %v873_v39, %v464_v47  ;;  %v884_v61 = vadd.f32 %v876_v4, %v465_v26  ;;  %v1060_v10 = vadd.f32 %v1056_v60, %v890_v63  ;;  %1268 = vmatpush.bf16.msra.mxu1 %v1926_v3  ;;  %v1977_v47 = vld [vmem:[#allocation9] ss:$0 sm:$0xff]  ;;  %v1937_v3 = vld [vmem:[#allocation12 + $0x30] sm:$0xff] }
 0x135   :  { %1255 = vmatpush.bf16.msra.mxu0 %v1917_v21  ;;  %v1936_v21 = vld [vmem:[#allocation12 + $0x28] sm:$0xff] }
 0x136   :  { %887 = vst [vmem:[#allocation2 + $0x18] sm:$0xf] %v883_v55  ;;  %1411 = vmatpush.bf16.msra.mxu2 %v1937_v3  ;;  %v1903_v3 = vld [vmem:[#allocation16 + $0x68] sm:$0xf0] }
 0x137   :  { %888 = vst [vmem:[#allocation2 + $0x8] sm:$0xf] %v884_v61 }
 0x138   :  { %1062 = vst [vmem:[#allocation3 + $0x8] sm:$0xf] %v1060_v10  ;;  %1269 = vmatpush.bf16.msra.mxu1 %v1925_v13  ;;  %v1935_v13 = vld [vmem:[#allocation12 + $0x20] sm:$0xff] }
 0x139   :  { %1256 = vmatpush.bf16.msra.mxu0 %v1916_v17  ;;  %v1934_v17 = vld [vmem:[#allocation12 + $0x18] sm:$0xff] }
 0x13a   :  { %1412 = vmatpush.bf16.msra.mxu2 %v1936_v21 }
 0x13c   :  { %1270 = vmatpush.bf16.msra.mxu1 %v1924_v16  ;;  %v1933_v16 = vld [vmem:[#allocation12 + $0x10] sm:$0xff] }
 0x13d   :  { %1257 = vmatpush.bf16.msra.mxu0 %v1915_v1  ;;  %v1068_v30 = vld [vmem:[#allocation2 + $0x18] sm:$0xf]  ;;  %v1932_v1 = vld [vmem:[#allocation12 + $0x8] sm:$0xff] }
 0x13e   :  { %v1069_v2 = vld [vmem:[#allocation2 + $0x8] sm:$0xf]  ;;  %1413 = vmatpush.bf16.msra.mxu2 %v1935_v13 }
 0x13f   :  { %v1071_v41 = vld [vmem:[#allocation3 + $0x8] sm:$0xf] }
 0x140   :  { %v1073_v32 = vadd.f32 1e-10, %v1071_v41  ;;  %1271 = vmatpush.bf16.msra.mxu1 %v1923_v19  ;;  %v1893_v13 = vld [vmem:[#allocation16 + $0x50] sm:$0xf] }
 0x142   :  { %1081 = vperm.xlu1 %1976, %v1073_v32   ;;  %1414 = vmatpush.bf16.msra.mxu2 %v1934_v17  ;;  %v1950_v17 = vld [vmem:[#allocation16 + $0x54] sm:$0xf0] }
 0x146   :  { %1415 = vmatpush.bf16.msra.mxu2 %v1933_v16  ;;  %v1949_v16 = vld [vmem:[#allocation16 + $0x54] sm:$0xf] }
 0x14a   :  { %1416 = vmatpush.bf16.msra.mxu2 %v1932_v1  ;;  %v1894_v1 = vor.u32 %v1950_v17, %v1893_v13 }
 0x1a2   :  { %v1077_v56 = vpop.permute.xlu0 %1076 }
 0x1a3   :  { %1983 = vrcp.f32 %v1077_v56  ;;  %v1095_v50 = vand.u32 2147483648, %v1077_v56  ;;  %vm1089_vm15 = vweird.f32 %v1077_v56  ;;  %v1093_v52 = vand.u32 2147483647, %v1077_v56 }
 0x1a5   :  { %v1096_v5 = vor.u32 1.1754944e-38, %v1095_v50  ;;  %vm1094_vm7 = vcmp.eq.f32.partialorder %v1093_v52, 8.507059e+37 }
 0x1a9   :  { %v1984_v38 = vpop.eup %1983 }
 0x1aa   :  { %v1085_v33 = vmul.f32 %v1984_v38, %v1077_v56  ;;  %vm1090_vm8 = vweird.f32 %v1984_v38 }
 0x1ab   :  { %vm1091_vm5 = vmor %vm1089_vm15, %vm1090_vm8 }
 0x1ac   :  { %v1086_v51 = vsub.f32 1.0, %v1085_v33  ;;  %v1931_v33 = vld [vmem:[#allocation12] sm:$0xff] }
 0x1ad   :  { %1417 = vmatpush.bf16.msra.mxu2 %v1931_v33  ;;  %v1948_v33 = vld [vmem:[#allocation16 + $0x44] sm:$0xf0] }
 0x1ae   :  { %v1087_v18 = vmul.f32 %v1984_v38, %v1086_v51 }
 0x1b0   :  { %v1088_v62 = vadd.f32 %v1984_v38, %v1087_v18 }
 0x1b2   :  { %v1092_v43 = vsel %vm1091_vm5, %v1984_v38, %v1088_v62 }
 0x1b3   :  { %v1097_v46 = vsel %vm1094_vm7, %v1096_v5, %v1092_v43 }
 0x1b4   :  { %v1082_v15 = vpop.permute.xlu1 %1081  ;;  %v1098_v0 = vmul.f32 %v1097_v46, %v3099_v7  ;;  %v1099_v25 = vmul.f32 %v1097_v46, %v3106_v40  ;;  %v1978_v46 = vld [vmem:[%s3172_s3] ss:$0 sm:$0xff] }
 0x1b5   :  { %1985 = vrcp.f32 %v1082_v15  ;;  %v1111_v59 = vand.u32 2147483648, %v1082_v15  ;;  %v1109_v8 = vand.u32 2147483647, %v1082_v15  ;;  %vm1105_vm6 = vweird.f32 %v1082_v15 }
 0x1b6   :  { %1987 = vrcp.f32 %v2270_v48 }
 0x1b7   :  { %v1112_v44 = vor.u32 1.1754944e-38, %v1111_v59  ;;  %vm1110_vm10 = vcmp.eq.f32.partialorder %v1109_v8, 8.507059e+37 }
 0x1bb   :  { %v1986_v42 = vpop.eup %1985 }
 0x1bc   :  { %v1101_v58 = vmul.f32 %v1986_v42, %v1082_v15  ;;  %vm1106_vm4 = vweird.f32 %v1986_v42  ;;  %v1988_v40 = vpop.eup %1987 }
 0x1bd   :  { %vm1107_vm9 = vmor %vm1105_vm6, %vm1106_vm4  ;;  %v1286_v39 = vmul.f32 128.0, %v1988_v40  ;;  %vm1290_vm11 = vweird.f32 %v1988_v40 }
 0x1be   :  { %v1102_v24 = vsub.f32 1.0, %v1101_v58 }
 0x1bf   :  { %v1287_v20 = vsub.f32 1.0, %v1286_v39 }
 0x1c0   :  { %v1103_v14 = vmul.f32 %v1986_v42, %v1102_v24 }
 0x1c1   :  { %v1288_v4 = vmul.f32 %v1988_v40, %v1287_v20 }
 0x1c2   :  { %v1104_v37 = vadd.f32 %v1986_v42, %v1103_v14 }
 0x1c3   :  { %v1289_v63 = vadd.f32 %v1988_v40, %v1288_v4 }
 0x1c4   :  { %v1108_v12 = vsel %vm1107_vm9, %v1986_v42, %v1104_v37 }
 0x1c5   :  { %v1113_v34 = vsel %vm1110_vm10, %v1112_v44, %v1108_v12  ;;  %v3127_v31 = vsel %vm1290_vm11, %v1988_v40, %v1289_v63  ;;  %v1909_v63 = vld [vmem:[#allocation16 + $0x70] sm:$0xf] }
 0x1c6   :  { %v1114_v27 = vmul.f32 %v1113_v34, %v1068_v30  ;;  %v1115_v36 = vmul.f32 %v1113_v34, %v1069_v2  ;;  %v1979_v34 = vld [vmem:[#allocation10] ss:$0 sm:$0xff] }
 0x1c8   :  { %v1116_v29 = vpack.c.bf16 %v1114_v27, %v1098_v0  ;;  %v1117_v35 = vpack.c.bf16 %v1115_v36, %v1099_v25 }
 0x1ca   :  { %1258 = vmatmul.bf16.vlgmr.msra.gmra.mxu0 %v1116_v29  ;;  %1272 = vmatmul.bf16.vlgmr.msra.gmra.mxu1 %v1117_v35 }
 0x247   :  { %v1259_v6 = vpop.f32.mrf.mxu0  ;;  %v1273_v45 = vpop.f32.mrf.mxu1 }
 0x248   :  { %v1260_v9 = vadd.f32 %v1977_v47, %v1259_v6 }
 0x24a   :  { %v1274_v7 = vadd.f32 %v1273_v45, %v1260_v9  ;;  %v1980_v45 = vld [vmem:[#allocation13] ss:$0 sm:$0xff] }
 0x24f   :  { %v1261_v11 = vpop.f32.mrf.mxu0  ;;  %v1275_v26 = vpop.f32.mrf.mxu1 }
 0x250   :  { %v1262_v49 = vadd.f32 %v1977_v47, %v1261_v11 }
 0x252   :  { %v1276_v53 = vadd.f32 %v1275_v26, %v1262_v49 }
 0x254   :  { %v1282_v22 = vsel %vm299_vm0, %v1276_v53, 0.0 }
 0x255   :  { %1283 = vadd.xlane.f32.xlu2 %v1282_v22 }
 0x25d   :  { %1280 = vadd.xlane.f32.xlu2 %v1274_v7 }
 0x2c8   :  { %v1284_v55 = vpop.xlane.xlu2 %1283 }
 0x2c9   :  { %v1293_v60 = vmul.f32 %v3127_v31, %v1284_v55 }
 0x2cb   :  { %v1295_v32 = vsub.f32 %v1276_v53, %v1293_v60 }
 0x2cd   :  { %v1297_v57 = vmul.f32 %v1295_v32, %v1295_v32 }
 0x2cf   :  { %v1300_v23 = vsel %vm299_vm0, %v1297_v57, 0.0  ;;  %v1952_v57 = vld [vmem:[#allocation16 + $0x64] sm:$0xf0] }
 0x2d0   :  { %v1281_v54 = vpop.xlane.xlu2 %1280 }
 0x2d1   :  { %v1292_v61 = vmul.f32 %v3127_v31, %v1281_v54  ;;  %v1954_v54 = vld [vmem:[#allocation16 + $0x74] sm:$0xf0] }
 0x2d2   :  { %v1910_v60 = vor.u32 %v1954_v54, %v1909_v63 }
 0x2d3   :  { %v1294_v10 = vsub.f32 %v1274_v7, %v1292_v61  ;;  %v1953_v61 = vld [vmem:[#allocation16 + $0x74] sm:$0xf] }
 0x2d4   :  { %1583 = vmatpush.bf16.msra.mxu3 %v1910_v60 }
 0x2d5   :  { %v1296_v41 = vmul.f32 %v1294_v10, %v1294_v10 }
 0x2d7   :  { %1298 = vadd.xlane.f32.xlu2 %v1296_v41 }
 0x2df   :  { %1301 = vadd.xlane.f32.xlu2 %v1300_v23  ;;  %v1951_v23 = vld [vmem:[#allocation16 + $0x64] sm:$0xf] }
 0x2e0   :  { %v1906_v21 = vor.u32 %v1951_v23, %v1903_v3  ;;  %v1982_v23 = vld [vmem:[#allocation15] ss:$0 sm:$0xff] }
 0x34a   :  { %v1299_v19 = vpop.xlane.xlu2 %1298 }
 0x34b   :  { %v1303_v56 = vmul.f32 %v1299_v19, %v3127_v31  ;;  %v1895_v19 = vld [vmem:[#allocation16 + $0x58] sm:$0xf0] }
 0x34d   :  { %v1305_v38 = vadd.f32 1e-05, %v1303_v56  ;;  %v1898_v56 = vor.u32 %v1949_v16, %v1895_v19 }
 0x34f   :  { %1989 = vrsqrt.f32 %v1305_v38  ;;  %vm1313_vm13 = vweird.f32 %v1305_v38 }
 0x352   :  { %v1302_v51 = vpop.xlane.xlu2 %1301 }
 0x353   :  { %v1304_v15 = vmul.f32 %v1302_v51, %v3127_v31  ;;  %v1947_v51 = vld [vmem:[#allocation16 + $0x44] sm:$0xf] }
 0x355   :  { %v1990_v18 = vpop.eup %1989  ;;  %v1306_v42 = vadd.f32 1e-05, %v1304_v15 }
 0x356   :  { %v1308_v58 = vmul.f32 %v1990_v18, %v1305_v38  ;;  %vm1314_vm12 = vweird.f32 %v1990_v18  ;;  %v1885_v38 = vld [vmem:[#allocation16 + $0x40] sm:$0xf] }
 0x357   :  { %1991 = vrsqrt.f32 %v1306_v42  ;;  %vm1315_vm14 = vmor %vm1313_vm13, %vm1314_vm12  ;;  %vm1323_vm2 = vweird.f32 %v1306_v42  ;;  %v1886_v15 = vor.u32 %v1948_v33, %v1885_v38  ;;  %v1497_v38 = vld [vmem:[%s3179_s10] sm:$0x3] }
 0x358   :  { %v1309_v62 = vmul.f32 %v1990_v18, %v1308_v58  ;;  %v1877_v58 = vld [vmem:[#allocation16 + $0x30] sm:$0xf] }
 0x35a   :  { %v1310_v50 = vmul.f32 0.5, %v1309_v62  ;;  %v1946_v62 = vld [vmem:[#allocation16 + $0x34] sm:$0xf0] }
 0x35c   :  { %v1311_v24 = vsub.f32 1.5, %v1310_v50  ;;  %v1945_v50 = vld [vmem:[#allocation16 + $0x34] sm:$0xf] }
 0x35d   :  { %v1992_v52 = vpop.eup %1991 }
 0x35e   :  { %v1312_v59 = vmul.f32 %v1990_v18, %v1311_v24  ;;  %v1318_v14 = vmul.f32 %v1992_v52, %v1306_v42  ;;  %vm1324_vm1 = vweird.f32 %v1992_v52  ;;  %v1878_v24 = vor.u32 %v1946_v62, %v1877_v58 }
 0x35f   :  { %vm1325_vm3 = vmor %vm1323_vm2, %vm1324_vm1 }
 0x360   :  { %v1316_v43 = vsel %vm1315_vm14, %v1990_v18, %v1312_v59  ;;  %v1319_v8 = vmul.f32 %v1992_v52, %v1318_v14  ;;  %v1887_v18 = vld [vmem:[#allocation16 + $0x48] sm:$0xf0]  ;;  %v1869_v14 = vld [vmem:[#allocation16 + $0x20] sm:$0xf] }
 0x361   :  { %v1327_v37 = vmul.f32 %v1316_v43, %v1294_v10  ;;  %v1911_v10 = vld [vmem:[#allocation16 + $0x78] sm:$0xf0]  ;;  %v1890_v42 = vor.u32 %v1947_v51, %v1887_v18  ;;  %v1944_v43 = vld [vmem:[#allocation16 + $0x24] sm:$0xf0]  ;;  %v1500_v51 = vperm.slane %v1497_v38, 1 }
 0x362   :  { %v1320_v5 = vmul.f32 0.5, %v1319_v8  ;;  %v1914_v41 = vor.u32 %v1953_v61, %v1911_v10  ;;  %v1943_v8 = vld [vmem:[#allocation16 + $0x24] sm:$0xf] }
 0x363   :  { %v1332_v30 = vmul.f32 %v1978_v46, %v1327_v37  ;;  %v1871_v37 = vld [vmem:[#allocation16 + $0x28] sm:$0xf0] }
 0x364   :  { %v1321_v44 = vsub.f32 1.5, %v1320_v5  ;;  %1597 = vmatpush.bf16.msrb.mxu0 %v1914_v41  ;;  %v1870_v5 = vor.u32 %v1944_v43, %v1869_v14  ;;  %v2271_v14 = vmov 256.0  }
 0x365   :  { %v1337_v25 = vadd.f32 %v1979_v34, %v1332_v30  ;;  %v1942_v30 = vld [vmem:[#allocation16 + $0x14] sm:$0xf0] }
 0x366   :  { %v1322_v12 = vmul.f32 %v1992_v52, %v1321_v44  ;;  %v1874_v44 = vor.u32 %v1943_v8, %v1871_v37 }
 0x367   :  { %v1339_v29 = vmax.f32 %v1337_v25, 0.0 }
 0x368   :  { %v1326_v2 = vsel %vm1325_vm3, %v1992_v52, %v1322_v12  ;;  %1598 = vmatpush.bf16.msrb.mxu0 %v1906_v21  ;;  %v1879_v52 = vld [vmem:[#allocation16 + $0x38] sm:$0xf0]  ;;  %v1861_v12 = vld [vmem:[#allocation16 + $0x10] sm:$0xf] }
 0x369   :  { %v1328_v0 = vmul.f32 %v1326_v2, %v1295_v32  ;;  %v1901_v32 = vld [vmem:[#allocation16 + $0x60] sm:$0xf]  ;;  %v1882_v59 = vor.u32 %v1945_v50, %v1879_v52 }
 0x36a   :  { %v1902_v28 = vor.u32 %v1952_v57, %v1901_v32 }
 0x36b   :  { %v1333_v27 = vmul.f32 %v1978_v46, %v1328_v0  ;;  %v1862_v0 = vor.u32 %v1942_v30, %v1861_v12 }
 0x36c   :  { %1584 = vmatpush.bf16.msra.mxu3 %v1902_v28  ;;  %1599 = vmatpush.bf16.msrb.mxu0 %v1898_v56 }
 0x36d   :  { %v1338_v36 = vadd.f32 %v1979_v34, %v1333_v27  ;;  %v1941_v34 = vld [vmem:[#allocation16 + $0x14] sm:$0xf]  ;;  %v1863_v27 = vld [vmem:[#allocation16 + $0x18] sm:$0xf0] }
 0x36e   :  { %v1866_v25 = vor.u32 %v1941_v34, %v1863_v27 }
 0x36f   :  { %v1340_v35 = vmax.f32 %v1338_v36, 0.0  ;;  %v1853_v36 = vld [vmem:[#allocation16] sm:$0xf] }
 0x370   :  { %1585 = vmatpush.bf16.msra.mxu3 %v1894_v1  ;;  %1600 = vmatpush.bf16.msrb.mxu0 %v1890_v42 }
 0x371   :  { %v1341_v6 = vpack.c.bf16 %v1340_v35, %v1339_v29  ;;  %v1940_v29 = vld [vmem:[#allocation16 + $0x4] sm:$0xf0] }
 0x373   :  { %1418 = vmatmul.bf16.vlgmr.msra.gmra.mxu2 %v1341_v6  ;;  %v1939_v6 = vld [vmem:[#allocation16 + $0x4] sm:$0xf] }
 0x374   :  { %1586 = vmatpush.bf16.msra.mxu3 %v1886_v15  ;;  %1601 = vmatpush.bf16.msrb.mxu0 %v1882_v59  ;;  %v1499_v15 = vperm.slane %v1497_v38, 0 }
 0x378   :  { %1587 = vmatpush.bf16.msra.mxu3 %v1878_v24  ;;  %1602 = vmatpush.bf16.msrb.mxu0 %v1874_v44 }
 0x37c   :  { %1588 = vmatpush.bf16.msra.mxu3 %v1870_v5  ;;  %1603 = vmatpush.bf16.msrb.mxu0 %v1866_v25 }
 0x380   :  { %1589 = vmatpush.bf16.msra.mxu3 %v1862_v0 }
 0x3f6   :  { %v1419_v47 = vpop.f32.mrf.mxu2 }
 0x3f7   :  { %v1420_v11 = vadd.f32 %v1980_v45, %v1419_v47  ;;  %v1854_v47 = vor.u32 %v1940_v29, %v1853_v36 }
 0x3f9   :  { %1426 = vadd.xlane.f32.xlu2 %v1420_v11  ;;  %1590 = vmatpush.bf16.msra.mxu3 %v1854_v47 }
 0x3fe   :  { %v1421_v49 = vpop.f32.mrf.mxu2 }
 0x3ff   :  { %v1422_v26 = vadd.f32 %v1980_v45, %v1421_v49  ;;  %v1855_v45 = vld [vmem:[#allocation16 + $0x8] sm:$0xf0] }
 0x401   :  { %v1428_v53 = vsel %vm299_vm0, %v1422_v26, 0.0 }
 0x402   :  { %1429 = vadd.xlane.f32.xlu1 %v1428_v53 }
 0x46c   :  { %v1427_v22 = vpop.xlane.xlu2 %1426 }
 0x46d   :  { %v1431_v9 = vmul.f32 %v1427_v22, %v3127_v31 }
 0x46f   :  { %v3139_v7 = vsub.f32 %v1420_v11, %v1431_v9  ;;  %v1858_v11 = vor.u32 %v1939_v6, %v1855_v45 }
 0x471   :  { %v1435_v48 = vmul.f32 %v3139_v7, %v3139_v7  ;;  %1604 = vmatpush.bf16.msrb.mxu0 %v1858_v11 }
 0x473   :  { %1437 = vadd.xlane.f32.xlu0 %v1435_v48 }
 0x475   :  { %v1430_v40 = vpop.xlane.xlu1 %1429 }
 0x476   :  { %v1432_v39 = vmul.f32 %v1430_v40, %v3127_v31 }
 0x478   :  { %v3144_v20 = vsub.f32 %v1422_v26, %v1432_v39 }
 0x47a   :  { %v1436_v4 = vmul.f32 %v3144_v20, %v3144_v20 }
 0x47c   :  { %v1439_v55 = vsel %vm299_vm0, %v1436_v4, 0.0 }
 0x47d   :  { %1440 = vadd.xlane.f32.xlu2 %v1439_v55 }
 0x4e6   :  { %v1438_v46 = vpop.xlane.xlu0 %1437 }
 0x4e7   :  { %v1442_v2 = vmul.f32 %v1438_v46, %v3127_v31 }
 0x4e9   :  { %v1444_v35 = vadd.f32 1e-05, %v1442_v2 }
 0x4eb   :  { %1993 = vrsqrt.f32 %v1444_v35  ;;  %vm1452_vm15 = vweird.f32 %v1444_v35 }
 0x4f0   :  { %v1441_v49 = vpop.xlane.xlu2 %1440 }
 0x4f1   :  { %v1994_v26 = vpop.eup %1993  ;;  %v1443_v53 = vmul.f32 %v1441_v49, %v3127_v31  ;;  %v1981_v31 = vld [vmem:[%s3176_s7] ss:$0 sm:$0xff] }
 0x4f2   :  { %v1447_v22 = vmul.f32 %v1994_v26, %v1444_v35  ;;  %vm1453_vm8 = vweird.f32 %v1994_v26 }
 0x4f3   :  { %v1445_v9 = vadd.f32 1e-05, %v1443_v53  ;;  %vm1454_vm5 = vmor %vm1452_vm15, %vm1453_vm8 }
 0x4f4   :  { %v1448_v48 = vmul.f32 %v1994_v26, %v1447_v22 }
 0x4f5   :  { %1995 = vrsqrt.f32 %v1445_v9  ;;  %vm1462_vm6 = vweird.f32 %v1445_v9 }
 0x4f6   :  { %v1449_v40 = vmul.f32 0.5, %v1448_v48  ;;  %1997 = vrcp.f32 %v2271_v14 }
 0x4f8   :  { %v1450_v39 = vsub.f32 1.5, %v1449_v40 }
 0x4fa   :  { %v1451_v4 = vmul.f32 %v1994_v26, %v1450_v39 }
 0x4fb   :  { %v1996_v55 = vpop.eup %1995 }
 0x4fc   :  { %v1457_v63 = vmul.f32 %v1996_v55, %v1445_v9  ;;  %v1455_v54 = vsel %vm1454_vm5, %v1994_v26, %v1451_v4  ;;  %vm1463_vm4 = vweird.f32 %v1996_v55  ;;  %v1998_v43 = vpop.eup %1997 }
 0x4fd   :  { %v1466_v10 = vmul.f32 %v1455_v54, %v3139_v7  ;;  %vm1464_vm7 = vmor %vm1462_vm6, %vm1463_vm4  ;;  %v1622_v8 = vmul.f32 256.0, %v1998_v43  ;;  %vm1626_vm9 = vweird.f32 %v1998_v43 }
 0x4fe   :  { %v1458_v61 = vmul.f32 %v1996_v55, %v1457_v63 }
 0x4ff   :  { %v1471_v57 = vmul.f32 %v1981_v31, %v1466_v10  ;;  %v1623_v5 = vsub.f32 1.0, %v1622_v8 }
 0x500   :  { %v1459_v60 = vmul.f32 0.5, %v1458_v61 }
 0x501   :  { %v1476_v13 = vadd.f32 %v1982_v23, %v1471_v57  ;;  %v1624_v37 = vmul.f32 %v1998_v43, %v1623_v5 }
 0x502   :  { %v1460_v41 = vsub.f32 1.5, %v1459_v60  ;;  %v1611_v60 = vld [vmem:[%s3180_s11] sm:$0x3]  ;;  %s2272_s11 = smov [#allocation19]  }
 0x503   :  { %v1478_v16 = vmax.f32 %v1476_v13, 0.0  ;;  %v1625_v46 = vadd.f32 %v1998_v43, %v1624_v37  ;;  %v1675_v57 = vperm.slane %v1611_v60, 0  ;;  %s1700_s18 = sshll.u32 %s2272_s11, 4  ;;  %s1701_s18 = int_to_ptr.vmem [resolvable:$true] %s1700_s18 }
 0x504   :  { %v1461_v32 = vmul.f32 %v1996_v55, %v1460_v41 }
 0x505   :  { %v1627_v44 = vsel %vm1626_vm9, %v1998_v43, %v1625_v46 }
 0x506   :  { %v1465_v28 = vsel %vm1464_vm7, %v1996_v55, %v1461_v32 }
 0x507   :  { %v1467_v3 = vmul.f32 %v1465_v28, %v3144_v20 }
 0x509   :  { %v1472_v21 = vmul.f32 %v1981_v31, %v1467_v3  ;;  %v1612_v31 = vld [vmem:[#allocation18] sm:$0x3] }
 0x50a   :  { %v1684_v3 = vperm.slane %v1612_v31, 0  ;;  %v1685_v13 = vperm.slane %v1612_v31, 1 }
 0x50b   :  { %v1477_v17 = vadd.f32 %v1982_v23, %v1472_v21  ;;  %v1676_v23 = vperm.slane %v1611_v60, 1 }
 0x50d   :  { %v1479_v1 = vmax.f32 %v1477_v17, 0.0 }
 0x50f   :  { %v1480_v7 = vpack.c.bf16 %v1479_v1, %v1478_v16 }
 0x511   :  { %1591 = vmatmul.bf16.vlgmr.msra.gmra.mxu3 %v1480_v7  ;;  %1605 = vmatmul.bf16.vlgmr.msrb.gmra.mxu0 %v1480_v7 }
 0x58e   :  { %v1606_v19 = vpop.f32.mrf.mxu0 }
 0x58f   :  { %v1607_v52 = vadd.f32 %v1606_v19, %v1500_v51 }
 0x594   :  { %v1592_v56 = vpop.f32.mrf.mxu3 }
 0x595   :  { %v1593_v24 = vadd.f32 %v1592_v56, %v1499_v15 }
 0x596   :  { %v1608_v33 = vpop.f32.mrf.mxu0 }
 0x597   :  { %v1609_v18 = vadd.f32 %v1608_v33, %v1500_v51  ;;  %v1613_v59 = vadd.f32 %v1607_v52, %v1593_v24 }
 0x599   :  { %v1617_v62 = vsel %vm299_vm0, %v1609_v18, 0.0 }
 0x59c   :  { %v1594_v42 = vpop.f32.mrf.mxu3 }
 0x59d   :  { %v1595_v20 = vadd.f32 %v1594_v42, %v1499_v15 }
 0x59f   :  { %v1616_v58 = vsel %vm299_vm0, %v1595_v20, 0.0 }
 0x5a0   :  { %v1618_v50 = vadd.f32 %v1617_v62, %v1616_v58 }
 0x5a2   :  { %1619 = vadd.xlane.f32.xlu2 %v1618_v50 }
 0x5aa   :  { %1614 = vadd.xlane.f32.xlu2 %v1613_v59 }
 0x615   :  { %v1620_v12 = vpop.xlane.xlu2 %1619 }
 0x616   :  { %v1629_v30 = vmul.f32 %v1627_v44, %v1620_v12 }
 0x618   :  { %v1632_v34 = vsub.f32 %v1595_v20, %v1629_v30  ;;  %v1633_v2 = vsub.f32 %v1609_v18, %v1629_v30 }
 0x61a   :  { %v1636_v0 = vmul.f32 %v1632_v34, %v1632_v34  ;;  %v1637_v27 = vmul.f32 %v1633_v2, %v1633_v2 }
 0x61c   :  { %v1641_v25 = vsel %vm299_vm0, %v1636_v0, 0.0  ;;  %v1642_v36 = vsel %vm299_vm0, %v1637_v27, 0.0 }
 0x61d   :  { %v1615_v29 = vpop.xlane.xlu2 %1614  ;;  %v1643_v35 = vadd.f32 %v1642_v36, %v1641_v25 }
 0x61e   :  { %v1628_v6 = vmul.f32 %v1627_v44, %v1615_v29 }
 0x61f   :  { %1644 = vadd.xlane.f32.xlu1 %v1643_v35 }
 0x620   :  { %v1630_v45 = vsub.f32 %v1593_v24, %v1628_v6  ;;  %v1631_v47 = vsub.f32 %v1607_v52, %v1628_v6 }
 0x622   :  { %v1634_v11 = vmul.f32 %v1630_v45, %v1630_v45  ;;  %v1635_v49 = vmul.f32 %v1631_v47, %v1631_v47 }
 0x624   :  { %v1638_v26 = vadd.f32 %v1635_v49, %v1634_v11 }
 0x626   :  { %1639 = vadd.xlane.f32.xlu2 %v1638_v26 }
 0x692   :  { %v1645_v53 = vpop.xlane.xlu1 %1644 }
 0x693   :  { %v1647_v22 = vmul.f32 %v1645_v53, %v1627_v44 }
 0x695   :  { %v1649_v9 = vadd.f32 1e-05, %v1647_v22 }
 0x697   :  { %1999 = vrsqrt.f32 %v1649_v9  ;;  %vm1666_vm10 = vweird.f32 %v1649_v9 }
 0x699   :  { %v1640_v48 = vpop.xlane.xlu2 %1639 }
 0x69a   :  { %v1646_v40 = vmul.f32 %v1640_v48, %v1627_v44 }
 0x69c   :  { %v1648_v39 = vadd.f32 1e-05, %v1646_v40 }
 0x69d   :  { %v2000_v4 = vpop.eup %1999 }
 0x69e   :  { %v1661_v55 = vmul.f32 %v2000_v4, %v1649_v9  ;;  %2001 = vrsqrt.f32 %v1648_v39  ;;  %vm1667_vm0 = vweird.f32 %v2000_v4  ;;  %vm1656_vm13 = vweird.f32 %v1648_v39 }
 0x69f   :  { %vm1668_vm11 = vmor %vm1666_vm10, %vm1667_vm0 }
 0x6a0   :  { %v1662_v63 = vmul.f32 %v2000_v4, %v1661_v55 }
 0x6a2   :  { %v1663_v54 = vmul.f32 0.5, %v1662_v63 }
 0x6a4   :  { %v2002_v61 = vpop.eup %2001  ;;  %v1664_v10 = vsub.f32 1.5, %v1663_v54 }
 0x6a5   :  { %v1651_v41 = vmul.f32 %v2002_v61, %v1648_v39  ;;  %vm1657_vm12 = vweird.f32 %v2002_v61 }
 0x6a6   :  { %v1665_v32 = vmul.f32 %v2000_v4, %v1664_v10  ;;  %vm1658_vm14 = vmor %vm1656_vm13, %vm1657_vm12 }
 0x6a7   :  { %v1652_v28 = vmul.f32 %v2002_v61, %v1651_v41 }
 0x6a8   :  { %v1669_v21 = vsel %vm1668_vm11, %v2000_v4, %v1665_v32 }
 0x6a9   :  { %v1672_v17 = vmul.f32 %v1669_v21, %v1632_v34  ;;  %v1673_v16 = vmul.f32 %v1669_v21, %v1633_v2  ;;  %v1653_v1 = vmul.f32 0.5, %v1652_v28 }
 0x6ab   :  { %v1681_v7 = vmul.f32 %v1675_v57, %v1672_v17  ;;  %v1682_v19 = vmul.f32 %v1676_v23, %v1673_v16  ;;  %v1654_v56 = vsub.f32 1.5, %v1653_v1 }
 0x6ad   :  { %v1690_v38 = vadd.f32 %v1684_v3, %v1681_v7  ;;  %v1691_v33 = vadd.f32 %v1685_v13, %v1682_v19  ;;  %v1655_v51 = vmul.f32 %v2002_v61, %v1654_v56 }
 0x6af   :  { %1694 = vst [vmem:[#allocation19 + $0x10] sm:$0xf] %v1690_v38  ;;  %v1659_v15 = vsel %vm1658_vm14, %v2002_v61, %v1655_v51 }
 0x6b0   :  { %1695 = vst [vmem:[#allocation19 + $0x18] sm:$0xf] %v1691_v33  ;;  %v1670_v18 = vmul.f32 %v1659_v15, %v1630_v45  ;;  %v1671_v42 = vmul.f32 %v1659_v15, %v1631_v47 }
 0x6b2   :  { %v1679_v20 = vmul.f32 %v1675_v57, %v1670_v18  ;;  %v1680_v58 = vmul.f32 %v1676_v23, %v1671_v42 }
 0x6b4   :  { %v1688_v62 = vadd.f32 %v1684_v3, %v1679_v20  ;;  %v1689_v50 = vadd.f32 %v1685_v13, %v1680_v58 }
 0x6b6   :  { %1692 = vst [vmem:[#allocation19] sm:$0xff] %v1688_v62 }
 0x6b7   :  { %1693 = vst [vmem:[#allocation19 + $0x8] sm:$0xff] %v1689_v50 }
 0x6b8   :  { %1708 = dma.vmem_to_hbm [thread:$0]  %s1701_s18, 512, %s1703_s1, [#allocation6], %s2273_s9, %s2273_s9, %s2274_s21  }
 0x6b9   :  { %2253 = dma.done.wait [#allocation6], 512  }
 0x6ba   :  { %2254 = vsyncadd [#allocation6], 4294966784 }
 0x6bb   :  { %1713 = vsyncpa [#allocation5], 1 }
 0x6bc   :  { %1714 = vsyncpa [#allocation8], 1 }
 0x6bd   :  { %1715 = vsyncpa [#allocation11], 1 }
 0x6be   :  { %1716 = vsyncpa [#allocation14], 1 }
 0x6bf   :  { %1717 = vsyncpa [#allocation17], 1 }
 0x6c0   :  { %1718 = vsyncpa [#allocation6], 1 }

</bundles_post_ra>
